<compile_context>
chip_gen: v6e
topology: v6e:2x2x1
jax: 0.10.0
libtpu: 0.0.40
codegen_flags: <defaults>
</compile_context>

<pallas_src>
import jax
import jax.numpy as jnp
from jax import lax
from jax.experimental import pallas as pl
from jax.experimental.pallas import tpu as pltpu

HIDDEN_SIZE = 64
INPUT_SIZE = 54
NUM_CLASSES = 4
NUM_LAYERS = 1          # single layer, as in the PyTorch module

NUM_GATES = 4
GATE_PAD = 128          # each LSTM gate padded to a full 128-lane vreg
H_PAD = 128             # hidden/cell state padded to 128 lanes (valid: [0, 64))
D_PAD = 64              # input features padded 54 -> 64
B_PAD = 8               # batch padded to 8 sublanes
OUT_PAD = 128           # fc output padded to 128 lanes (valid: [0, 4))
G_TOT = NUM_GATES * GATE_PAD   # 512


def _lstm_fc_kernel(x_ref, w_ih_ref, w_hh_ref, b_ref, w_fc_ref, b_fc_ref,
                    out_ref, gx_ref):
    """x_ref: (T*B_PAD, D_PAD) bf16 time-major-flattened input.
    gx_ref: (T*B_PAD, G_TOT) f32 scratch holding the hoisted x-projection."""
    T = gx_ref.shape[0] // B_PAD   # static

    # ---- hoisted input projection: one (T*B, D) @ (D, 4*128) MXU matmul ----
    gx = jnp.dot(x_ref[...], w_ih_ref[...], preferred_element_type=jnp.float32)
    gx_ref[...] = gx + b_ref[...]          # fold (b_ih + b_hh) in once

    # ---- sequential recurrence: only h @ W_hh^T on the critical path ----
    def step(t, carry):
        h, c = carry                                        # (B_PAD, H_PAD) f32
        row = pl.multiple_of(t * B_PAD, B_PAD)
        g_x = gx_ref[pl.ds(row, B_PAD), :]                  # (B_PAD, 512)
        g_h = jnp.dot(h.astype(jnp.bfloat16), w_hh_ref[...],
                      preferred_element_type=jnp.float32)   # (B_PAD, 512)
        gates = g_x + g_h

        # PyTorch LSTM gate order: i, f, g, o — each in its own 128-lane slot.
        i = jax.nn.sigmoid(gates[:, 0 * GATE_PAD:1 * GATE_PAD])
        f = jax.nn.sigmoid(gates[:, 1 * GATE_PAD:2 * GATE_PAD])
        g = jnp.tanh(gates[:, 2 * GATE_PAD:3 * GATE_PAD])
        o = jax.nn.sigmoid(gates[:, 3 * GATE_PAD:4 * GATE_PAD])

        c_new = f * c + i * g
        h_new = o * jnp.tanh(c_new)
        return h_new, c_new

    h0 = jnp.zeros((B_PAD, H_PAD), jnp.float32)
    c0 = jnp.zeros((B_PAD, H_PAD), jnp.float32)
    h_T, _ = lax.fori_loop(0, T, step, (h0, c0), unroll=True)

    # ---- final Linear on the last hidden state (lane-dense padded output) ----
    out_ref[...] = (jnp.dot(h_T, w_fc_ref[...],
                            preferred_element_type=jnp.float32)
                    + b_fc_ref[...])


def rnn_forward(x, params):
    """x: (B, T, INPUT_SIZE) float32, batch_first like the PyTorch module."""
    B, T, D = x.shape
    H, C = HIDDEN_SIZE, NUM_CLASSES
    assert B <= B_PAD and D <= D_PAD and H == HIDDEN_SIZE

    # ---- input: time-major, pad batch->8 sublanes and features->64 lanes ----
    x_tm = jnp.transpose(x, (1, 0, 2))                               # (T, B, D)
    x_tm = jnp.pad(x_tm, ((0, 0), (0, B_PAD - B), (0, D_PAD - D)))
    x2d = x_tm.reshape(T * B_PAD, D_PAD).astype(jnp.bfloat16)

    # ---- weights: transpose, align each gate to its own 128-lane slot ----
    w_ih_t = params["w_ih"].T.reshape(D, NUM_GATES, H)               # (D, 4, H)
    w_ih_t = jnp.pad(w_ih_t, ((0, D_PAD - D), (0, 0), (0, GATE_PAD - H)))
    w_ih_t = w_ih_t.reshape(D_PAD, G_TOT).astype(jnp.bfloat16)

    w_hh_t = params["w_hh"].T.reshape(H, NUM_GATES, H)               # (H, 4, H)
    w_hh_t = jnp.pad(w_hh_t, ((0, H_PAD - H), (0, 0), (0, GATE_PAD - H)))
    w_hh_t = w_hh_t.reshape(H_PAD, G_TOT).astype(jnp.bfloat16)

    b = (params["b_ih"] + params["b_hh"]).reshape(NUM_GATES, H)
    b = jnp.pad(b, ((0, 0), (0, GATE_PAD - H))).reshape(1, G_TOT)
    b = b.astype(jnp.float32)

    w_fc_t = jnp.pad(params["w_fc"].T, ((0, H_PAD - H), (0, OUT_PAD - C)))
    b_fc = jnp.pad(params["b_fc"], (0, OUT_PAD - C)).reshape(1, OUT_PAD)

    out = pl.pallas_call(
        _lstm_fc_kernel,
        out_shape=jax.ShapeDtypeStruct((B_PAD, OUT_PAD), jnp.float32),
        grid_spec=pltpu.PrefetchScalarGridSpec(
            num_scalar_prefetch=0,
            grid=(1,),                      # whole recurrence in one invocation
            in_specs=[
                pl.BlockSpec((T * B_PAD, D_PAD), lambda i: (0, 0)),  # x (flat)
                pl.BlockSpec((D_PAD, G_TOT), lambda i: (0, 0)),      # W_ih^T pad
                pl.BlockSpec((H_PAD, G_TOT), lambda i: (0, 0)),      # W_hh^T pad
                pl.BlockSpec((1, G_TOT), lambda i: (0, 0)),          # b_ih+b_hh
                pl.BlockSpec((H_PAD, OUT_PAD), lambda i: (0, 0)),    # W_fc^T pad
                pl.BlockSpec((1, OUT_PAD), lambda i: (0, 0)),        # b_fc pad
            ],
            out_specs=pl.BlockSpec((B_PAD, OUT_PAD), lambda i: (0, 0)),
            scratch_shapes=[
                pltpu.VMEM((T * B_PAD, G_TOT), jnp.float32),  # hoisted x-proj
            ],
        ),
        compiler_params=pltpu.CompilerParams(
            dimension_semantics=("arbitrary",)),
        # TODO(synk): for large batches on v7x, add a leading "parallel" batch
        # grid axis so both TensorCores run independent slices of the batch.
    )(x2d, w_ih_t, w_hh_t, b, w_fc_t, b_fc)

    return out[:B, :C]


def _reference_forward(x, params):
    """Pure-JAX f32 reference (lax.scan LSTM + linear) for correctness check."""
    H = HIDDEN_SIZE
    w_ih, w_hh = params["w_ih"], params["w_hh"]
    b = params["b_ih"] + params["b_hh"]

    def step(carry, x_t):
        h, c = carry
        gates = x_t @ w_ih.T + h @ w_hh.T + b
        i = jax.nn.sigmoid(gates[:, 0:H])
        f = jax.nn.sigmoid(gates[:, H:2 * H])
        g = jnp.tanh(gates[:, 2 * H:3 * H])
        o = jax.nn.sigmoid(gates[:, 3 * H:4 * H])
        c_new = f * c + i * g
        h_new = o * jnp.tanh(c_new)
        return (h_new, c_new), None

    B = x.shape[0]
    h0 = jnp.zeros((B, H), jnp.float32)
    c0 = jnp.zeros((B, H), jnp.float32)
    (h_T, _), _ = jax.lax.scan(step, (h0, c0), jnp.transpose(x, (1, 0, 2)))
    return h_T @ params["w_fc"].T + params["b_fc"]


def init_params(key):
    """Deterministic init, shapes matching nn.LSTM / nn.Linear in the module."""
    H, D, C = HIDDEN_SIZE, INPUT_SIZE, NUM_CLASSES
    k = 1.0 / jnp.sqrt(jnp.float32(H))
    keys = jax.random.split(key, 6)
    u = lambda kk, shape: jax.random.uniform(kk, shape, jnp.float32, -k, k)
    return {
        "w_ih": u(keys[0], (4 * H, D)),   # weight_ih_l0
        "w_hh": u(keys[1], (4 * H, H)),   # weight_hh_l0
        "b_ih": u(keys[2], (4 * H,)),     # bias_ih_l0
        "b_hh": u(keys[3], (4 * H,)),     # bias_hh_l0
        "w_fc": u(keys[4], (C, H)),       # fc.weight
        "b_fc": u(keys[5], (C,)),         # fc.bias
    }


if __name__ == "__main__":
    key = jax.random.PRNGKey(0)
    pkey, xkey = jax.random.split(key)
    params = init_params(pkey)

    batch, seq = 2, 8
    x = jax.random.normal(xkey, (batch, seq, INPUT_SIZE), jnp.float32)

    out = rnn_forward(x, params)
    out = jax.block_until_ready(out)

    ref = jax.block_until_ready(_reference_forward(x, params))
    assert out.shape == (batch, NUM_CLASSES)
    # bf16 MXU operands with f32 accumulation -> loosened tolerance vs f32 ref.
    assert jnp.allclose(out, ref, atol=1e-2, rtol=1e-2)

    print("KERNEL_OK")
</pallas_src>

<mosaic_0001>
module attributes {stable_mosaic.version = 11 : i64} {
  func.func @_lstm_fc_kernel(%arg0: i32, %arg1: memref<64x64xbf16, #tpu.memory_space<vmem>>, %arg2: memref<64x512xbf16, #tpu.memory_space<vmem>>, %arg3: memref<128x512xbf16, #tpu.memory_space<vmem>>, %arg4: memref<1x512xf32, #tpu.memory_space<vmem>>, %arg5: memref<128x128xf32, #tpu.memory_space<vmem>>, %arg6: memref<1x128xf32, #tpu.memory_space<vmem>>, %arg7: memref<8x128xf32, #tpu.memory_space<vmem>>, %arg8: memref<64x512xf32, #tpu.memory_space<vmem>>) attributes {dimension_semantics = [#tpu.dimension_semantics<arbitrary>], iteration_bounds = array<i64: 1>, scalar_prefetch = 0 : i64, scratch_operands = 1 : i64, tpu.core_type = #tpu.core_type<tc>, window_params = [{pipeline_mode = #tpu.pipeline_mode<synchronous>, transform_indices = @transform_0, window_bounds = array<i64: 64, 64>}, {pipeline_mode = #tpu.pipeline_mode<synchronous>, transform_indices = @transform_1, window_bounds = array<i64: 64, 512>}, {pipeline_mode = #tpu.pipeline_mode<synchronous>, transform_indices = @transform_2, window_bounds = array<i64: 128, 512>}, {pipeline_mode = #tpu.pipeline_mode<synchronous>, transform_indices = @transform_3, window_bounds = array<i64: 1, 512>}, {pipeline_mode = #tpu.pipeline_mode<synchronous>, transform_indices = @transform_4, window_bounds = array<i64: 128, 128>}, {pipeline_mode = #tpu.pipeline_mode<synchronous>, transform_indices = @transform_5, window_bounds = array<i64: 1, 128>}, {pipeline_mode = #tpu.pipeline_mode<synchronous>, transform_indices = @transform_6, window_bounds = array<i64: 8, 128>}]} {
    %c0 = arith.constant 0 : index
    %c0_0 = arith.constant 0 : index
    %0 = vector.load %arg1[%c0, %c0_0] : memref<64x64xbf16, #tpu.memory_space<vmem>>, vector<64x64xbf16>
    %c0_1 = arith.constant 0 : index
    %c0_2 = arith.constant 0 : index
    %1 = vector.load %arg2[%c0_1, %c0_2] : memref<64x512xbf16, #tpu.memory_space<vmem>>, vector<64x512xbf16>
    %cst = arith.constant dense<0.000000e+00> : vector<64x512xf32>
    %2 = tpu.matmul %0, %1, %cst {dimension_numbers = #tpu.dot_dimension_numbers<[1], [0], [0], [1], [0, 0, 1, 1], [], []>} : vector<64x64xbf16>, vector<64x512xbf16>, vector<64x512xf32> -> vector<64x512xf32>
    %c0_3 = arith.constant 0 : index
    %c0_4 = arith.constant 0 : index
    %3 = vector.load %arg4[%c0_3, %c0_4] : memref<1x512xf32, #tpu.memory_space<vmem>>, vector<1x512xf32>
    %4 = vector.broadcast %3 : vector<1x512xf32> to vector<64x512xf32>
    %5 = arith.addf %2, %4 : vector<64x512xf32>
    %c0_5 = arith.constant 0 : index
    %c0_6 = arith.constant 0 : index
    %6 = vector.load %arg8[%c0_5, %c0_6] : memref<64x512xf32, #tpu.memory_space<vmem>>, vector<64x512xf32>
    tpu.vector_store %arg8[%c0_5, %c0_6], %5 {strides = array<i32>} : memref<64x512xf32, #tpu.memory_space<vmem>>, vector<64x512xf32>,
    %cst_7 = arith.constant 0.000000e+00 : f32
    %7 = vector.broadcast %cst_7 : f32 to vector<8x128xf32>
    %cst_8 = arith.constant 0.000000e+00 : f32
    %8 = vector.broadcast %cst_8 : f32 to vector<8x128xf32>
    %c0_i32 = arith.constant 0 : i32
    %c8_i32 = arith.constant 8 : i32
    %9 = arith.muli %c0_i32, %c8_i32 : i32
    %10 = tpu.assume_multiple %9, 8 : i32
    %11 = arith.index_cast %10 : i32 to index
    %c0_9 = arith.constant 0 : index
    %12 = vector.load %arg8[%11, %c0_9] : memref<64x512xf32, #tpu.memory_space<vmem>>, vector<8x512xf32>
    %13 = arith.truncf %7 : vector<8x128xf32> to vector<8x128xbf16>
    %c0_10 = arith.constant 0 : index
    %c0_11 = arith.constant 0 : index
    %14 = vector.load %arg3[%c0_10, %c0_11] : memref<128x512xbf16, #tpu.memory_space<vmem>>, vector<128x512xbf16>
    %cst_12 = arith.constant dense<0.000000e+00> : vector<8x512xf32>
    %15 = tpu.matmul %13, %14, %cst_12 {dimension_numbers = #tpu.dot_dimension_numbers<[1], [0], [0], [1], [0, 0, 1, 1], [], []>} : vector<8x128xbf16>, vector<128x512xbf16>, vector<8x512xf32> -> vector<8x512xf32>
    %16 = arith.addf %12, %15 : vector<8x512xf32>
    %17 = vector.extract_strided_slice %16 {offsets = [0, 0], sizes = [8, 128], strides = [1, 1]} : vector<8x512xf32> to vector<8x128xf32>
    %18 = arith.negf %17 : vector<8x128xf32>
    %19 = math.exp %18 : vector<8x128xf32>
    %cst_13 = arith.constant 1.000000e+00 : f32
    %20 = vector.broadcast %cst_13 : f32 to vector<8x128xf32>
    %21 = arith.addf %20, %19 : vector<8x128xf32>
    %22 = arith.divf %20, %21 : vector<8x128xf32>
    %23 = vector.extract_strided_slice %16 {offsets = [0, 128], sizes = [8, 128], strides = [1, 1]} : vector<8x512xf32> to vector<8x128xf32>
    %24 = arith.negf %23 : vector<8x128xf32>
    %25 = math.exp %24 : vector<8x128xf32>
    %cst_14 = arith.constant 1.000000e+00 : f32
    %26 = vector.broadcast %cst_14 : f32 to vector<8x128xf32>
    %27 = arith.addf %26, %25 : vector<8x128xf32>
    %28 = arith.divf %26, %27 : vector<8x128xf32>
    %29 = vector.extract_strided_slice %16 {offsets = [0, 256], sizes = [8, 128], strides = [1, 1]} : vector<8x512xf32> to vector<8x128xf32>
    %30 = math.tanh %29 : vector<8x128xf32>
    %31 = vector.extract_strided_slice %16 {offsets = [0, 384], sizes = [8, 128], strides = [1, 1]} : vector<8x512xf32> to vector<8x128xf32>
    %32 = arith.negf %31 : vector<8x128xf32>
    %33 = math.exp %32 : vector<8x128xf32>
    %cst_15 = arith.constant 1.000000e+00 : f32
    %34 = vector.broadcast %cst_15 : f32 to vector<8x128xf32>
    %35 = arith.addf %34, %33 : vector<8x128xf32>
    %36 = arith.divf %34, %35 : vector<8x128xf32>
    %37 = arith.mulf %28, %8 : vector<8x128xf32>
    %38 = arith.mulf %22, %30 : vector<8x128xf32>
    %39 = arith.addf %37, %38 : vector<8x128xf32>
    %40 = math.tanh %39 : vector<8x128xf32>
    %41 = arith.mulf %36, %40 : vector<8x128xf32>
    %c1_i32 = arith.constant 1 : i32
    %c8_i32_16 = arith.constant 8 : i32
    %42 = arith.muli %c1_i32, %c8_i32_16 : i32
    %43 = tpu.assume_multiple %42, 8 : i32
    %44 = arith.index_cast %43 : i32 to index
    %c0_17 = arith.constant 0 : index
    %45 = vector.load %arg8[%44, %c0_17] : memref<64x512xf32, #tpu.memory_space<vmem>>, vector<8x512xf32>
    %46 = arith.truncf %41 : vector<8x128xf32> to vector<8x128xbf16>
    %c0_18 = arith.constant 0 : index
    %c0_19 = arith.constant 0 : index
    %47 = vector.load %arg3[%c0_18, %c0_19] : memref<128x512xbf16, #tpu.memory_space<vmem>>, vector<128x512xbf16>
    %cst_20 = arith.constant dense<0.000000e+00> : vector<8x512xf32>
    %48 = tpu.matmul %46, %47, %cst_20 {dimension_numbers = #tpu.dot_dimension_numbers<[1], [0], [0], [1], [0, 0, 1, 1], [], []>} : vector<8x128xbf16>, vector<128x512xbf16>, vector<8x512xf32> -> vector<8x512xf32>
    %49 = arith.addf %45, %48 : vector<8x512xf32>
    %50 = vector.extract_strided_slice %49 {offsets = [0, 0], sizes = [8, 128], strides = [1, 1]} : vector<8x512xf32> to vector<8x128xf32>
    %51 = arith.negf %50 : vector<8x128xf32>
    %52 = math.exp %51 : vector<8x128xf32>
    %cst_21 = arith.constant 1.000000e+00 : f32
    %53 = vector.broadcast %cst_21 : f32 to vector<8x128xf32>
    %54 = arith.addf %53, %52 : vector<8x128xf32>
    %55 = arith.divf %53, %54 : vector<8x128xf32>
    %56 = vector.extract_strided_slice %49 {offsets = [0, 128], sizes = [8, 128], strides = [1, 1]} : vector<8x512xf32> to vector<8x128xf32>
    %57 = arith.negf %56 : vector<8x128xf32>
    %58 = math.exp %57 : vector<8x128xf32>
    %cst_22 = arith.constant 1.000000e+00 : f32
    %59 = vector.broadcast %cst_22 : f32 to vector<8x128xf32>
    %60 = arith.addf %59, %58 : vector<8x128xf32>
    %61 = arith.divf %59, %60 : vector<8x128xf32>
    %62 = vector.extract_strided_slice %49 {offsets = [0, 256], sizes = [8, 128], strides = [1, 1]} : vector<8x512xf32> to vector<8x128xf32>
    %63 = math.tanh %62 : vector<8x128xf32>
    %64 = vector.extract_strided_slice %49 {offsets = [0, 384], sizes = [8, 128], strides = [1, 1]} : vector<8x512xf32> to vector<8x128xf32>
    %65 = arith.negf %64 : vector<8x128xf32>
    %66 = math.exp %65 : vector<8x128xf32>
    %cst_23 = arith.constant 1.000000e+00 : f32
    %67 = vector.broadcast %cst_23 : f32 to vector<8x128xf32>
    %68 = arith.addf %67, %66 : vector<8x128xf32>
    %69 = arith.divf %67, %68 : vector<8x128xf32>
    %70 = arith.mulf %61, %39 : vector<8x128xf32>
    %71 = arith.mulf %55, %63 : vector<8x128xf32>
    %72 = arith.addf %70, %71 : vector<8x128xf32>
    %73 = math.tanh %72 : vector<8x128xf32>
    %74 = arith.mulf %69, %73 : vector<8x128xf32>
    %c2_i32 = arith.constant 2 : i32
    %c8_i32_24 = arith.constant 8 : i32
    %75 = arith.muli %c2_i32, %c8_i32_24 : i32
    %76 = tpu.assume_multiple %75, 8 : i32
    %77 = arith.index_cast %76 : i32 to index
    %c0_25 = arith.constant 0 : index
    %78 = vector.load %arg8[%77, %c0_25] : memref<64x512xf32, #tpu.memory_space<vmem>>, vector<8x512xf32>
    %79 = arith.truncf %74 : vector<8x128xf32> to vector<8x128xbf16>
    %c0_26 = arith.constant 0 : index
    %c0_27 = arith.constant 0 : index
    %80 = vector.load %arg3[%c0_26, %c0_27] : memref<128x512xbf16, #tpu.memory_space<vmem>>, vector<128x512xbf16>
    %cst_28 = arith.constant dense<0.000000e+00> : vector<8x512xf32>
    %81 = tpu.matmul %79, %80, %cst_28 {dimension_numbers = #tpu.dot_dimension_numbers<[1], [0], [0], [1], [0, 0, 1, 1], [], []>} : vector<8x128xbf16>, vector<128x512xbf16>, vector<8x512xf32> -> vector<8x512xf32>
    %82 = arith.addf %78, %81 : vector<8x512xf32>
    %83 = vector.extract_strided_slice %82 {offsets = [0, 0], sizes = [8, 128], strides = [1, 1]} : vector<8x512xf32> to vector<8x128xf32>
    %84 = arith.negf %83 : vector<8x128xf32>
    %85 = math.exp %84 : vector<8x128xf32>
    %cst_29 = arith.constant 1.000000e+00 : f32
    %86 = vector.broadcast %cst_29 : f32 to vector<8x128xf32>
    %87 = arith.addf %86, %85 : vector<8x128xf32>
    %88 = arith.divf %86, %87 : vector<8x128xf32>
    %89 = vector.extract_strided_slice %82 {offsets = [0, 128], sizes = [8, 128], strides = [1, 1]} : vector<8x512xf32> to vector<8x128xf32>
    %90 = arith.negf %89 : vector<8x128xf32>
    %91 = math.exp %90 : vector<8x128xf32>
    %cst_30 = arith.constant 1.000000e+00 : f32
    %92 = vector.broadcast %cst_30 : f32 to vector<8x128xf32>
    %93 = arith.addf %92, %91 : vector<8x128xf32>
    %94 = arith.divf %92, %93 : vector<8x128xf32>
    %95 = vector.extract_strided_slice %82 {offsets = [0, 256], sizes = [8, 128], strides = [1, 1]} : vector<8x512xf32> to vector<8x128xf32>
    %96 = math.tanh %95 : vector<8x128xf32>
    %97 = vector.extract_strided_slice %82 {offsets = [0, 384], sizes = [8, 128], strides = [1, 1]} : vector<8x512xf32> to vector<8x128xf32>
    %98 = arith.negf %97 : vector<8x128xf32>
    %99 = math.exp %98 : vector<8x128xf32>
    %cst_31 = arith.constant 1.000000e+00 : f32
    %100 = vector.broadcast %cst_31 : f32 to vector<8x128xf32>
    %101 = arith.addf %100, %99 : vector<8x128xf32>
    %102 = arith.divf %100, %101 : vector<8x128xf32>
    %103 = arith.mulf %94, %72 : vector<8x128xf32>
    %104 = arith.mulf %88, %96 : vector<8x128xf32>
    %105 = arith.addf %103, %104 : vector<8x128xf32>
    %106 = math.tanh %105 : vector<8x128xf32>
    %107 = arith.mulf %102, %106 : vector<8x128xf32>
    %c3_i32 = arith.constant 3 : i32
    %c8_i32_32 = arith.constant 8 : i32
    %108 = arith.muli %c3_i32, %c8_i32_32 : i32
    %109 = tpu.assume_multiple %108, 8 : i32
    %110 = arith.index_cast %109 : i32 to index
    %c0_33 = arith.constant 0 : index
    %111 = vector.load %arg8[%110, %c0_33] : memref<64x512xf32, #tpu.memory_space<vmem>>, vector<8x512xf32>
    %112 = arith.truncf %107 : vector<8x128xf32> to vector<8x128xbf16>
    %c0_34 = arith.constant 0 : index
    %c0_35 = arith.constant 0 : index
    %113 = vector.load %arg3[%c0_34, %c0_35] : memref<128x512xbf16, #tpu.memory_space<vmem>>, vector<128x512xbf16>
    %cst_36 = arith.constant dense<0.000000e+00> : vector<8x512xf32>
    %114 = tpu.matmul %112, %113, %cst_36 {dimension_numbers = #tpu.dot_dimension_numbers<[1], [0], [0], [1], [0, 0, 1, 1], [], []>} : vector<8x128xbf16>, vector<128x512xbf16>, vector<8x512xf32> -> vector<8x512xf32>
    %115 = arith.addf %111, %114 : vector<8x512xf32>
    %116 = vector.extract_strided_slice %115 {offsets = [0, 0], sizes = [8, 128], strides = [1, 1]} : vector<8x512xf32> to vector<8x128xf32>
    %117 = arith.negf %116 : vector<8x128xf32>
    %118 = math.exp %117 : vector<8x128xf32>
    %cst_37 = arith.constant 1.000000e+00 : f32
    %119 = vector.broadcast %cst_37 : f32 to vector<8x128xf32>
    %120 = arith.addf %119, %118 : vector<8x128xf32>
    %121 = arith.divf %119, %120 : vector<8x128xf32>
    %122 = vector.extract_strided_slice %115 {offsets = [0, 128], sizes = [8, 128], strides = [1, 1]} : vector<8x512xf32> to vector<8x128xf32>
    %123 = arith.negf %122 : vector<8x128xf32>
    %124 = math.exp %123 : vector<8x128xf32>
    %cst_38 = arith.constant 1.000000e+00 : f32
    %125 = vector.broadcast %cst_38 : f32 to vector<8x128xf32>
    %126 = arith.addf %125, %124 : vector<8x128xf32>
    %127 = arith.divf %125, %126 : vector<8x128xf32>
    %128 = vector.extract_strided_slice %115 {offsets = [0, 256], sizes = [8, 128], strides = [1, 1]} : vector<8x512xf32> to vector<8x128xf32>
    %129 = math.tanh %128 : vector<8x128xf32>
    %130 = vector.extract_strided_slice %115 {offsets = [0, 384], sizes = [8, 128], strides = [1, 1]} : vector<8x512xf32> to vector<8x128xf32>
    %131 = arith.negf %130 : vector<8x128xf32>
    %132 = math.exp %131 : vector<8x128xf32>
    %cst_39 = arith.constant 1.000000e+00 : f32
    %133 = vector.broadcast %cst_39 : f32 to vector<8x128xf32>
    %134 = arith.addf %133, %132 : vector<8x128xf32>
    %135 = arith.divf %133, %134 : vector<8x128xf32>
    %136 = arith.mulf %127, %105 : vector<8x128xf32>
    %137 = arith.mulf %121, %129 : vector<8x128xf32>
    %138 = arith.addf %136, %137 : vector<8x128xf32>
    %139 = math.tanh %138 : vector<8x128xf32>
    %140 = arith.mulf %135, %139 : vector<8x128xf32>
    %c4_i32 = arith.constant 4 : i32
    %c8_i32_40 = arith.constant 8 : i32
    %141 = arith.muli %c4_i32, %c8_i32_40 : i32
    %142 = tpu.assume_multiple %141, 8 : i32
    %143 = arith.index_cast %142 : i32 to index
    %c0_41 = arith.constant 0 : index
    %144 = vector.load %arg8[%143, %c0_41] : memref<64x512xf32, #tpu.memory_space<vmem>>, vector<8x512xf32>
    %145 = arith.truncf %140 : vector<8x128xf32> to vector<8x128xbf16>
    %c0_42 = arith.constant 0 : index
    %c0_43 = arith.constant 0 : index
    %146 = vector.load %arg3[%c0_42, %c0_43] : memref<128x512xbf16, #tpu.memory_space<vmem>>, vector<128x512xbf16>
    %cst_44 = arith.constant dense<0.000000e+00> : vector<8x512xf32>
    %147 = tpu.matmul %145, %146, %cst_44 {dimension_numbers = #tpu.dot_dimension_numbers<[1], [0], [0], [1], [0, 0, 1, 1], [], []>} : vector<8x128xbf16>, vector<128x512xbf16>, vector<8x512xf32> -> vector<8x512xf32>
    %148 = arith.addf %144, %147 : vector<8x512xf32>
    %149 = vector.extract_strided_slice %148 {offsets = [0, 0], sizes = [8, 128], strides = [1, 1]} : vector<8x512xf32> to vector<8x128xf32>
    %150 = arith.negf %149 : vector<8x128xf32>
    %151 = math.exp %150 : vector<8x128xf32>
    %cst_45 = arith.constant 1.000000e+00 : f32
    %152 = vector.broadcast %cst_45 : f32 to vector<8x128xf32>
    %153 = arith.addf %152, %151 : vector<8x128xf32>
    %154 = arith.divf %152, %153 : vector<8x128xf32>
    %155 = vector.extract_strided_slice %148 {offsets = [0, 128], sizes = [8, 128], strides = [1, 1]} : vector<8x512xf32> to vector<8x128xf32>
    %156 = arith.negf %155 : vector<8x128xf32>
    %157 = math.exp %156 : vector<8x128xf32>
    %cst_46 = arith.constant 1.000000e+00 : f32
    %158 = vector.broadcast %cst_46 : f32 to vector<8x128xf32>
    %159 = arith.addf %158, %157 : vector<8x128xf32>
    %160 = arith.divf %158, %159 : vector<8x128xf32>
    %161 = vector.extract_strided_slice %148 {offsets = [0, 256], sizes = [8, 128], strides = [1, 1]} : vector<8x512xf32> to vector<8x128xf32>
    %162 = math.tanh %161 : vector<8x128xf32>
    %163 = vector.extract_strided_slice %148 {offsets = [0, 384], sizes = [8, 128], strides = [1, 1]} : vector<8x512xf32> to vector<8x128xf32>
    %164 = arith.negf %163 : vector<8x128xf32>
    %165 = math.exp %164 : vector<8x128xf32>
    %cst_47 = arith.constant 1.000000e+00 : f32
    %166 = vector.broadcast %cst_47 : f32 to vector<8x128xf32>
    %167 = arith.addf %166, %165 : vector<8x128xf32>
    %168 = arith.divf %166, %167 : vector<8x128xf32>
    %169 = arith.mulf %160, %138 : vector<8x128xf32>
    %170 = arith.mulf %154, %162 : vector<8x128xf32>
    %171 = arith.addf %169, %170 : vector<8x128xf32>
    %172 = math.tanh %171 : vector<8x128xf32>
    %173 = arith.mulf %168, %172 : vector<8x128xf32>
    %c5_i32 = arith.constant 5 : i32
    %c8_i32_48 = arith.constant 8 : i32
    %174 = arith.muli %c5_i32, %c8_i32_48 : i32
    %175 = tpu.assume_multiple %174, 8 : i32
    %176 = arith.index_cast %175 : i32 to index
    %c0_49 = arith.constant 0 : index
    %177 = vector.load %arg8[%176, %c0_49] : memref<64x512xf32, #tpu.memory_space<vmem>>, vector<8x512xf32>
    %178 = arith.truncf %173 : vector<8x128xf32> to vector<8x128xbf16>
    %c0_50 = arith.constant 0 : index
    %c0_51 = arith.constant 0 : index
    %179 = vector.load %arg3[%c0_50, %c0_51] : memref<128x512xbf16, #tpu.memory_space<vmem>>, vector<128x512xbf16>
    %cst_52 = arith.constant dense<0.000000e+00> : vector<8x512xf32>
    %180 = tpu.matmul %178, %179, %cst_52 {dimension_numbers = #tpu.dot_dimension_numbers<[1], [0], [0], [1], [0, 0, 1, 1], [], []>} : vector<8x128xbf16>, vector<128x512xbf16>, vector<8x512xf32> -> vector<8x512xf32>
    %181 = arith.addf %177, %180 : vector<8x512xf32>
    %182 = vector.extract_strided_slice %181 {offsets = [0, 0], sizes = [8, 128], strides = [1, 1]} : vector<8x512xf32> to vector<8x128xf32>
    %183 = arith.negf %182 : vector<8x128xf32>
    %184 = math.exp %183 : vector<8x128xf32>
    %cst_53 = arith.constant 1.000000e+00 : f32
    %185 = vector.broadcast %cst_53 : f32 to vector<8x128xf32>
    %186 = arith.addf %185, %184 : vector<8x128xf32>
    %187 = arith.divf %185, %186 : vector<8x128xf32>
    %188 = vector.extract_strided_slice %181 {offsets = [0, 128], sizes = [8, 128], strides = [1, 1]} : vector<8x512xf32> to vector<8x128xf32>
    %189 = arith.negf %188 : vector<8x128xf32>
    %190 = math.exp %189 : vector<8x128xf32>
    %cst_54 = arith.constant 1.000000e+00 : f32
    %191 = vector.broadcast %cst_54 : f32 to vector<8x128xf32>
    %192 = arith.addf %191, %190 : vector<8x128xf32>
    %193 = arith.divf %191, %192 : vector<8x128xf32>
    %194 = vector.extract_strided_slice %181 {offsets = [0, 256], sizes = [8, 128], strides = [1, 1]} : vector<8x512xf32> to vector<8x128xf32>
    %195 = math.tanh %194 : vector<8x128xf32>
    %196 = vector.extract_strided_slice %181 {offsets = [0, 384], sizes = [8, 128], strides = [1, 1]} : vector<8x512xf32> to vector<8x128xf32>
    %197 = arith.negf %196 : vector<8x128xf32>
    %198 = math.exp %197 : vector<8x128xf32>
    %cst_55 = arith.constant 1.000000e+00 : f32
    %199 = vector.broadcast %cst_55 : f32 to vector<8x128xf32>
    %200 = arith.addf %199, %198 : vector<8x128xf32>
    %201 = arith.divf %199, %200 : vector<8x128xf32>
    %202 = arith.mulf %193, %171 : vector<8x128xf32>
    %203 = arith.mulf %187, %195 : vector<8x128xf32>
    %204 = arith.addf %202, %203 : vector<8x128xf32>
    %205 = math.tanh %204 : vector<8x128xf32>
    %206 = arith.mulf %201, %205 : vector<8x128xf32>
    %c6_i32 = arith.constant 6 : i32
    %c8_i32_56 = arith.constant 8 : i32
    %207 = arith.muli %c6_i32, %c8_i32_56 : i32
    %208 = tpu.assume_multiple %207, 8 : i32
    %209 = arith.index_cast %208 : i32 to index
    %c0_57 = arith.constant 0 : index
    %210 = vector.load %arg8[%209, %c0_57] : memref<64x512xf32, #tpu.memory_space<vmem>>, vector<8x512xf32>
    %211 = arith.truncf %206 : vector<8x128xf32> to vector<8x128xbf16>
    %c0_58 = arith.constant 0 : index
    %c0_59 = arith.constant 0 : index
    %212 = vector.load %arg3[%c0_58, %c0_59] : memref<128x512xbf16, #tpu.memory_space<vmem>>, vector<128x512xbf16>
    %cst_60 = arith.constant dense<0.000000e+00> : vector<8x512xf32>
    %213 = tpu.matmul %211, %212, %cst_60 {dimension_numbers = #tpu.dot_dimension_numbers<[1], [0], [0], [1], [0, 0, 1, 1], [], []>} : vector<8x128xbf16>, vector<128x512xbf16>, vector<8x512xf32> -> vector<8x512xf32>
    %214 = arith.addf %210, %213 : vector<8x512xf32>
    %215 = vector.extract_strided_slice %214 {offsets = [0, 0], sizes = [8, 128], strides = [1, 1]} : vector<8x512xf32> to vector<8x128xf32>
    %216 = arith.negf %215 : vector<8x128xf32>
    %217 = math.exp %216 : vector<8x128xf32>
    %cst_61 = arith.constant 1.000000e+00 : f32
    %218 = vector.broadcast %cst_61 : f32 to vector<8x128xf32>
    %219 = arith.addf %218, %217 : vector<8x128xf32>
    %220 = arith.divf %218, %219 : vector<8x128xf32>
    %221 = vector.extract_strided_slice %214 {offsets = [0, 128], sizes = [8, 128], strides = [1, 1]} : vector<8x512xf32> to vector<8x128xf32>
    %222 = arith.negf %221 : vector<8x128xf32>
    %223 = math.exp %222 : vector<8x128xf32>
    %cst_62 = arith.constant 1.000000e+00 : f32
    %224 = vector.broadcast %cst_62 : f32 to vector<8x128xf32>
    %225 = arith.addf %224, %223 : vector<8x128xf32>
    %226 = arith.divf %224, %225 : vector<8x128xf32>
    %227 = vector.extract_strided_slice %214 {offsets = [0, 256], sizes = [8, 128], strides = [1, 1]} : vector<8x512xf32> to vector<8x128xf32>
    %228 = math.tanh %227 : vector<8x128xf32>
    %229 = vector.extract_strided_slice %214 {offsets = [0, 384], sizes = [8, 128], strides = [1, 1]} : vector<8x512xf32> to vector<8x128xf32>
    %230 = arith.negf %229 : vector<8x128xf32>
    %231 = math.exp %230 : vector<8x128xf32>
    %cst_63 = arith.constant 1.000000e+00 : f32
    %232 = vector.broadcast %cst_63 : f32 to vector<8x128xf32>
    %233 = arith.addf %232, %231 : vector<8x128xf32>
    %234 = arith.divf %232, %233 : vector<8x128xf32>
    %235 = arith.mulf %226, %204 : vector<8x128xf32>
    %236 = arith.mulf %220, %228 : vector<8x128xf32>
    %237 = arith.addf %235, %236 : vector<8x128xf32>
    %238 = math.tanh %237 : vector<8x128xf32>
    %239 = arith.mulf %234, %238 : vector<8x128xf32>
    %c7_i32 = arith.constant 7 : i32
    %c8_i32_64 = arith.constant 8 : i32
    %240 = arith.muli %c7_i32, %c8_i32_64 : i32
    %241 = tpu.assume_multiple %240, 8 : i32
    %242 = arith.index_cast %241 : i32 to index
    %c0_65 = arith.constant 0 : index
    %243 = vector.load %arg8[%242, %c0_65] : memref<64x512xf32, #tpu.memory_space<vmem>>, vector<8x512xf32>
    %244 = arith.truncf %239 : vector<8x128xf32> to vector<8x128xbf16>
    %c0_66 = arith.constant 0 : index
    %c0_67 = arith.constant 0 : index
    %245 = vector.load %arg3[%c0_66, %c0_67] : memref<128x512xbf16, #tpu.memory_space<vmem>>, vector<128x512xbf16>
    %cst_68 = arith.constant dense<0.000000e+00> : vector<8x512xf32>
    %246 = tpu.matmul %244, %245, %cst_68 {dimension_numbers = #tpu.dot_dimension_numbers<[1], [0], [0], [1], [0, 0, 1, 1], [], []>} : vector<8x128xbf16>, vector<128x512xbf16>, vector<8x512xf32> -> vector<8x512xf32>
    %247 = arith.addf %243, %246 : vector<8x512xf32>
    %248 = vector.extract_strided_slice %247 {offsets = [0, 0], sizes = [8, 128], strides = [1, 1]} : vector<8x512xf32> to vector<8x128xf32>
    %249 = arith.negf %248 : vector<8x128xf32>
    %250 = math.exp %249 : vector<8x128xf32>
    %cst_69 = arith.constant 1.000000e+00 : f32
    %251 = vector.broadcast %cst_69 : f32 to vector<8x128xf32>
    %252 = arith.addf %251, %250 : vector<8x128xf32>
    %253 = arith.divf %251, %252 : vector<8x128xf32>
    %254 = vector.extract_strided_slice %247 {offsets = [0, 128], sizes = [8, 128], strides = [1, 1]} : vector<8x512xf32> to vector<8x128xf32>
    %255 = arith.negf %254 : vector<8x128xf32>
    %256 = math.exp %255 : vector<8x128xf32>
    %cst_70 = arith.constant 1.000000e+00 : f32
    %257 = vector.broadcast %cst_70 : f32 to vector<8x128xf32>
    %258 = arith.addf %257, %256 : vector<8x128xf32>
    %259 = arith.divf %257, %258 : vector<8x128xf32>
    %260 = vector.extract_strided_slice %247 {offsets = [0, 256], sizes = [8, 128], strides = [1, 1]} : vector<8x512xf32> to vector<8x128xf32>
    %261 = math.tanh %260 : vector<8x128xf32>
    %262 = vector.extract_strided_slice %247 {offsets = [0, 384], sizes = [8, 128], strides = [1, 1]} : vector<8x512xf32> to vector<8x128xf32>
    %263 = arith.negf %262 : vector<8x128xf32>
    %264 = math.exp %263 : vector<8x128xf32>
    %cst_71 = arith.constant 1.000000e+00 : f32
    %265 = vector.broadcast %cst_71 : f32 to vector<8x128xf32>
    %266 = arith.addf %265, %264 : vector<8x128xf32>
    %267 = arith.divf %265, %266 : vector<8x128xf32>
    %268 = arith.mulf %259, %237 : vector<8x128xf32>
    %269 = arith.mulf %253, %261 : vector<8x128xf32>
    %270 = arith.addf %268, %269 : vector<8x128xf32>
    %271 = math.tanh %270 : vector<8x128xf32>
    %272 = arith.mulf %267, %271 : vector<8x128xf32>
    %c8_i32_72 = arith.constant 8 : i32
    %c0_73 = arith.constant 0 : index
    %c0_74 = arith.constant 0 : index
    %273 = vector.load %arg5[%c0_73, %c0_74] : memref<128x128xf32, #tpu.memory_space<vmem>>, vector<128x128xf32>
    %cst_75 = arith.constant dense<0.000000e+00> : vector<8x128xf32>
    %274 = tpu.matmul %272, %273, %cst_75 {dimension_numbers = #tpu.dot_dimension_numbers<[1], [0], [0], [1], [0, 0, 1, 1], [], []>} : vector<8x128xf32>, vector<128x128xf32>, vector<8x128xf32> -> vector<8x128xf32>
    %c0_76 = arith.constant 0 : index
    %c0_77 = arith.constant 0 : index
    %275 = vector.load %arg6[%c0_76, %c0_77] : memref<1x128xf32, #tpu.memory_space<vmem>>, vector<1x128xf32>
    %276 = vector.broadcast %275 : vector<1x128xf32> to vector<8x128xf32>
    %277 = arith.addf %274, %276 : vector<8x128xf32>
    %c0_78 = arith.constant 0 : index
    %c0_79 = arith.constant 0 : index
    %278 = vector.load %arg7[%c0_78, %c0_79] : memref<8x128xf32, #tpu.memory_space<vmem>>, vector<8x128xf32>
    tpu.vector_store %arg7[%c0_78, %c0_79], %277 {strides = array<i32>} : memref<8x128xf32, #tpu.memory_space<vmem>>, vector<8x128xf32>,
    return
  }
  func.func @transform_0(%arg0: i32) -> (i32, i32) {
    %c0_i32 = arith.constant 0 : i32
    %c0_i32_0 = arith.constant 0 : i32
    %c0_i32_1 = arith.constant 0 : i32
    return %c0_i32, %c0_i32_0 : i32, i32
  }
  func.func @transform_1(%arg0: i32) -> (i32, i32) {
    %c0_i32 = arith.constant 0 : i32
    %c0_i32_0 = arith.constant 0 : i32
    %c0_i32_1 = arith.constant 0 : i32
    return %c0_i32, %c0_i32_0 : i32, i32
  }
  func.func @transform_2(%arg0: i32) -> (i32, i32) {
    %c0_i32 = arith.constant 0 : i32
    %c0_i32_0 = arith.constant 0 : i32
    %c0_i32_1 = arith.constant 0 : i32
    return %c0_i32, %c0_i32_0 : i32, i32
  }
  func.func @transform_3(%arg0: i32) -> (i32, i32) {
    %c0_i32 = arith.constant 0 : i32
    %c0_i32_0 = arith.constant 0 : i32
    %c0_i32_1 = arith.constant 0 : i32
    return %c0_i32, %c0_i32_0 : i32, i32
  }
  func.func @transform_4(%arg0: i32) -> (i32, i32) {
    %c0_i32 = arith.constant 0 : i32
    %c0_i32_0 = arith.constant 0 : i32
    %c0_i32_1 = arith.constant 0 : i32
    return %c0_i32, %c0_i32_0 : i32, i32
  }
  func.func @transform_5(%arg0: i32) -> (i32, i32) {
    %c0_i32 = arith.constant 0 : i32
    %c0_i32_0 = arith.constant 0 : i32
    %c0_i32_1 = arith.constant 0 : i32
    return %c0_i32, %c0_i32_0 : i32, i32
  }
  func.func @transform_6(%arg0: i32) -> (i32, i32) {
    %c0_i32 = arith.constant 0 : i32
    %c0_i32_0 = arith.constant 0 : i32
    %c0_i32_1 = arith.constant 0 : i32
    return %c0_i32, %c0_i32_0 : i32, i32
  }
}

</mosaic_0001>

<bundles_post_ra>
// kernel: tpu_custom_call.1
= control target key start
LH: loop header
LB: loop body
LE: loop exit
PB: predicated region body
PF: predicated region fallthrough
CT: control target
= control target key end

     0   :  { %11 = vsyncpa [#allocation4], 0  ;;  %s2773_s0 = inlined_call_operand.hbm [shape: bf16[64,64], index: 0, kind: input, shape index: {}]   ;;  %s2774_s1 = inlined_call_operand.hbm [shape: bf16[64,512], index: 1, kind: input, shape index: {}]   ;;  %s2775_s2 = inlined_call_operand.hbm [shape: bf16[128,512], index: 2, kind: input, shape index: {}]   ;;  %s2776_s3 = inlined_call_operand.vmem [shape: f32[1,512], index: 3, kind: input, shape index: {}]   ;;  %s2777_s4 = inlined_call_operand.hbm [shape: f32[128,128], index: 4, kind: input, shape index: {}]   ;;  %s2778_s5 = inlined_call_operand.vmem [shape: f32[1,128], index: 5, kind: input, shape index: {}]   ;;  %s2779_s6 = inlined_call_operand.hbm [shape: f32[8,128], index: 6, kind: output, shape index: {}]  }
   0x1   :  { %12 = vsyncpa [#allocation7], 0 }
   0x2   :  { %13 = vsyncpa [#allocation10], 0 }
   0x3   :  { %14 = vsyncpa [#allocation5], 0  ;;  %s2165_s21 = smov [#allocation6]  }
   0x4   :  { %s32_s22 = sshll.u32 %s2165_s21, 4  ;;  %s33_s22 = int_to_ptr.vmem [resolvable:$true] %s32_s22 }
   0x5   :  { %s2065_s23 = scalar_lea.vmem %s33_s22, 2048  ;;  %p2070_p1 = scmp.lt.s32.totalorder %s33_s22, %s33_s22 }
   0x6   :  { %p2066_p0 = scmp.ne.s32.totalorder %s33_s22, %s2065_s23  ;;  %p2071_p2 = scmp.lt.s32.totalorder %s2065_s23, %s2065_s23 }
   0x8   :  { %p2072_p3 = por %p2071_p2, %p2070_p1 }
   0xa   :  { %p2073_p4 = pnand %p2072_p3, %p2066_p0 }
   0xc   :  { %2076 = shalt.err (!%p2073_p4)
}
   0xd   :  { %s2166_s24 = smov 256   ;;  %s2167_s25 = smov 16  }
   0xe   :  { %38 = dma.hbm_to_vmem [thread:$0]  %s2774_s1, 2048, %s33_s22, [#allocation7], %s2166_s24, %s2166_s24, %s2167_s25  }
   0xf   :  { %s2168_s28 = smov [#allocation3]  }
  0x10   :  { %s20_s29 = sshll.u32 %s2168_s28, 4  ;;  %s21_s29 = int_to_ptr.vmem [resolvable:$true] %s20_s29 }
  0x11   :  { %s2085_s30 = scalar_lea.vmem %s21_s29, 512  ;;  %p2090_p6 = scmp.lt.s32.totalorder %s21_s29, %s21_s29 }
  0x12   :  { %p2086_p5 = scmp.ne.s32.totalorder %s21_s29, %s2085_s30  ;;  %p2091_p7 = scmp.lt.s32.totalorder %s2085_s30, %s2085_s30 }
  0x14   :  { %p2092_p8 = por %p2091_p7, %p2090_p6 }
  0x16   :  { %p2093_p9 = pnand %p2092_p8, %p2086_p5 }
  0x18   :  { %2096 = shalt.err (!%p2093_p9)
}
  0x19   :  { %s2169_s7 = smov 64   ;;  %s2170_s8 = smov 4  }
  0x1a   :  { %26 = dma.hbm_to_vmem [thread:$0]  %s2773_s0, 512, %s21_s29, [#allocation4], %s2169_s7, %s2169_s7, %s2170_s8  }
  0x1b   :  { %s2171_s11 = smov [#allocation8]   ;;  %s2172_s13 = smov [#allocation9]  }
  0x1c   :  { %s44_s12 = sshll.u32 %s2171_s11, 4  ;;  %s58_s1 = sshll.u32 %s2172_s13, 4  ;;  %s45_s12 = int_to_ptr.vmem [resolvable:$true] %s44_s12  ;;  %s59_s1 = int_to_ptr.vmem [resolvable:$true] %s58_s1 }
  0x1d   :  { %s2105_s14 = scalar_lea.vmem %s45_s12, 4096  ;;  %p2110_p11 = scmp.lt.s32.totalorder %s45_s12, %s45_s12 }
  0x1e   :  { %p2106_p10 = scmp.ne.s32.totalorder %s45_s12, %s2105_s14  ;;  %p2111_p12 = scmp.lt.s32.totalorder %s2105_s14, %s2105_s14 }
  0x20   :  { %p2112_p13 = por %p2111_p12, %p2110_p11 }
  0x22   :  { %p2113_p0 = pnand %p2112_p13, %p2106_p10 }
  0x24   :  { %2116 = shalt.err (!%p2113_p0)
}
  0x25   :  { %50 = dma.hbm_to_vmem [thread:$0]  %s2775_s2, 4096, %s45_s12, [#allocation7], %s2166_s24, %s2166_s24, %s2167_s25  }
  0x26   :  { %s2125_s0 = scalar_lea.vmem %s59_s1, 2048  ;;  %p2130_p2 = scmp.lt.s32.totalorder %s59_s1, %s59_s1 }
  0x27   :  { %p2126_p1 = scmp.ne.s32.totalorder %s59_s1, %s2125_s0  ;;  %p2131_p3 = scmp.lt.s32.totalorder %s2125_s0, %s2125_s0 }
  0x29   :  { %p2132_p4 = por %p2131_p3, %p2130_p2 }
  0x2b   :  { %p2133_p5 = pnand %p2132_p4, %p2126_p1 }
  0x2d   :  { %2136 = shalt.err (!%p2133_p5)
}
  0x2e   :  { %s2173_s17 = smov 128   ;;  %s2174_s18 = smov 8  }
  0x2f   :  { %64 = dma.hbm_to_vmem [thread:$0]  %s2777_s4, 2048, %s59_s1, [#allocation10], %s2173_s17, %s2173_s17, %s2174_s18  }
  0x30   :  { %2157 = dma.done.wait [#allocation4], 512  }
  0x31   :  { %2158 = vsyncadd [#allocation4], 4294966784 }
  0x32   :  { %2159 = dma.done.wait [#allocation7], 6144  }
  0x33   :  { %2160 = vsyncadd [#allocation7], 4294961152 }
  0x34   :  { %2161 = dma.done.wait [#allocation10], 2048  }
  0x35   :  { %2162 = vsyncadd [#allocation10], 4294965248  ;;  %v2780_v0 = vmov 0   ;;  %v1821_v1 = vld [vmem:[#allocation6 + $0x64] ss:$16 sps:$4 sm:$0xff]   ;;  %vm226_vm0 = vcmask 523264   ;;  %v106_v53 = vlaneseq }
  0x36   :  { %271 = vmatprep.mubr.bf16.mxu0 %v2780_v0  ;;  %344 = vmatprep.mubr.bf16.mxu1 %v2780_v0  ;;  %v1823_v2 = vld [vmem:[#allocation6 + $0x6c] ss:$16 sps:$4 sm:$0xff]   ;;  %v1825_v3 = vld [vmem:[#allocation6 + $0x60] ss:$16 sps:$4 sm:$0xff]   ;;  %v1826_v4 = vld [vmem:[#allocation6 + $0x68] ss:$16 sps:$4 sm:$0xff]  }
  0x37   :  { %247 = vmatprep.subr.bf16.mxu0 %v1821_v1  ;;  %320 = vmatprep.subr.bf16.mxu1 %v1823_v2  ;;  %v1827_v5 = vld [vmem:[#allocation6 + $0x44] ss:$16 sps:$4 sm:$0xff]   ;;  %v1829_v6 = vld [vmem:[#allocation6 + $0x4c] ss:$16 sps:$4 sm:$0xff]   ;;  %v1831_v7 = vld [vmem:[#allocation6 + $0x40] ss:$16 sps:$4 sm:$0xff]  }
  0x38   :  { %248 = vmatpush1.bf16.msra.mxu0 %v1825_v3  ;;  %321 = vmatpush1.bf16.msra.mxu1 %v1826_v4  ;;  %v1832_v8 = vld [vmem:[#allocation6 + $0x48] ss:$16 sps:$4 sm:$0xff]   ;;  %v1833_v9 = vld [vmem:[#allocation6 + $0x24] ss:$16 sps:$4 sm:$0xff]   ;;  %v1835_v10 = vld [vmem:[#allocation6 + $0x2c] ss:$16 sps:$4 sm:$0xff]  }
  0x39   :  { %249 = vmatprep.subr.bf16.mxu0 %v1827_v5  ;;  %322 = vmatprep.subr.bf16.mxu1 %v1829_v6  ;;  %v1837_v11 = vld [vmem:[#allocation6 + $0x20] ss:$16 sps:$4 sm:$0xff]   ;;  %v1838_v12 = vld [vmem:[#allocation6 + $0x28] ss:$16 sps:$4 sm:$0xff]   ;;  %v1839_v13 = vld [vmem:[#allocation6 + $0x4] ss:$16 sps:$4 sm:$0xff]  }
  0x3a   :  { %v1841_v14 = vld [vmem:[#allocation6 + $0xc] ss:$16 sps:$4 sm:$0xff]   ;;  %v1843_v15 = vld [vmem:[#allocation6] ss:$16 sps:$4 sm:$0xff]   ;;  %v1844_v16 = vld [vmem:[#allocation6 + $0x8] ss:$16 sps:$4 sm:$0xff]  }
  0x3b   :  { %v2234_v17 = vld [vmem:[#allocation8 + $0xe4] ss:$16 sps:$4 sm:$0xff]   ;;  %v2236_v18 = vld [vmem:[#allocation8 + $0xec] ss:$16 sps:$4 sm:$0xff]   ;;  %v2238_v20 = vld [vmem:[#allocation8 + $0xe0] ss:$16 sps:$4 sm:$0xff]  }
  0x3c   :  { %250 = vmatpush1.bf16.msra.mxu0 %v1831_v7  ;;  %323 = vmatpush1.bf16.msra.mxu1 %v1832_v8  ;;  %v1845_v19 = vld [vmem:[#allocation3] sm:$0xff]   ;;  %v2240_v21 = vld [vmem:[#allocation8 + $0xe8] ss:$16 sps:$4 sm:$0xff]   ;;  %v2246_v23 = vld [vmem:[#allocation8 + $0xcc] ss:$16 sps:$4 sm:$0xff]   ;;  %v107_v54 = vshrl.u32 %v106_v53, 7 }
  0x3d   :  { %251 = vmatprep.subr.bf16.mxu0 %v1833_v9  ;;  %324 = vmatprep.subr.bf16.mxu1 %v1835_v10  ;;  %v2242_v22 = vld [vmem:[#allocation8 + $0xc4] ss:$16 sps:$4 sm:$0xff]   ;;  %v2250_v24 = vld [vmem:[#allocation8 + $0xc0] ss:$16 sps:$4 sm:$0xff]   ;;  %v2254_v25 = vld [vmem:[#allocation8 + $0xc8] ss:$16 sps:$4 sm:$0xff]  }
  0x3e   :  { %v2256_v26 = vld [vmem:[#allocation8 + $0xa4] ss:$16 sps:$4 sm:$0xff]   ;;  %v2260_v27 = vld [vmem:[#allocation8 + $0xac] ss:$16 sps:$4 sm:$0xff]   ;;  %v2264_v29 = vld [vmem:[#allocation8 + $0xa0] ss:$16 sps:$4 sm:$0xff]  }
  0x3f   :  { %v1858_v28 = vld [vmem:[#allocation3 + $0x8] sm:$0xff]   ;;  %v2270_v31 = vld [vmem:[#allocation8 + $0x84] ss:$16 sps:$4 sm:$0xff]   ;;  %v2278_v33 = vld [vmem:[#allocation8 + $0x80] ss:$16 sps:$4 sm:$0xff]   ;;  %v116_v55 = vsub.s32 2, %v107_v54 }
  0x40   :  { %252 = vmatpush1.bf16.msra.mxu0 %v1837_v11  ;;  %325 = vmatpush1.bf16.msra.mxu1 %v1838_v12  ;;  %v2266_v30 = vld [vmem:[#allocation8 + $0xa8] ss:$16 sps:$4 sm:$0xff]   ;;  %v2274_v32 = vld [vmem:[#allocation8 + $0x8c] ss:$16 sps:$4 sm:$0xff]   ;;  %v2286_v35 = vld [vmem:[#allocation8 + $0x64] ss:$16 sps:$4 sm:$0xff]  }
  0x41   :  { %253 = vmatprep.subr.bf16.mxu0 %v1839_v13  ;;  %326 = vmatprep.subr.bf16.mxu1 %v1841_v14  ;;  %v2282_v34 = vld [vmem:[#allocation8 + $0x88] ss:$16 sps:$4 sm:$0xff]   ;;  %v2288_v36 = vld [vmem:[#allocation8 + $0x6c] ss:$16 sps:$4 sm:$0xff]   ;;  %v1871_v37 = vld [vmem:[#allocation3 + $0x10] sm:$0xff]   ;;  %v108_v56 = vsub.s32 0, %v107_v54 }
  0x42   :  { %v2292_v38 = vld [vmem:[#allocation8 + $0x60] ss:$16 sps:$4 sm:$0xff]   ;;  %v2296_v39 = vld [vmem:[#allocation8 + $0x68] ss:$16 sps:$4 sm:$0xff]   ;;  %v2298_v40 = vld [vmem:[#allocation8 + $0x44] ss:$16 sps:$4 sm:$0xff]  }
  0x43   :  { %v2302_v41 = vld [vmem:[#allocation8 + $0x4c] ss:$16 sps:$4 sm:$0xff]   ;;  %v2308_v42 = vld [vmem:[#allocation8 + $0x40] ss:$16 sps:$4 sm:$0xff]   ;;  %v2310_v43 = vld [vmem:[#allocation8 + $0x48] ss:$16 sps:$4 sm:$0xff]  }
  0x44   :  { %254 = vmatpush1.bf16.msra.mxu0 %v1843_v15  ;;  %327 = vmatpush1.bf16.msra.mxu1 %v1844_v16  ;;  %v2314_v44 = vld [vmem:[#allocation8 + $0x24] ss:$16 sps:$4 sm:$0xff]   ;;  %v2316_v45 = vld [vmem:[#allocation8 + $0x2c] ss:$16 sps:$4 sm:$0xff]   ;;  %v2322_v47 = vld [vmem:[#allocation8 + $0x20] ss:$16 sps:$4 sm:$0xff]  }
  0x45   :  { %616 = vmatprep.subr.bf16.mxu0 %v2234_v17  ;;  %657 = vmatprep.subr.bf16.mxu1 %v2236_v18  ;;  %v1884_v46 = vld [vmem:[#allocation3 + $0x18] sm:$0xff]   ;;  %v2328_v49 = vld [vmem:[#allocation8 + $0x4] ss:$16 sps:$4 sm:$0xff]   ;;  %v2336_v51 = vld [vmem:[#allocation8] ss:$16 sps:$4 sm:$0xff]   ;;  %v120_v57 = vsub.s32 3, %v107_v54 }
  0x46   :  { %v2324_v48 = vld [vmem:[#allocation8 + $0x28] ss:$16 sps:$4 sm:$0xff]   ;;  %v2330_v50 = vld [vmem:[#allocation8 + $0xc] ss:$16 sps:$4 sm:$0xff]   ;;  %v104_v58 = vld [vmem:[%s2776_s3] sm:$0xf] }
  0x47   :  { %1690 = vmatmul.mubr.msk.bf16.vlgmr.msra.gmra.mxu0 %vm226_vm0, %v1845_v19  ;;  %1694 = vmatmul.mubr.msk.bf16.vlgmr.msra.gmra.mxu1 %vm226_vm0, %v1845_v19  ;;  %v2338_v52 = vld [vmem:[#allocation8 + $0x8] ss:$16 sps:$4 sm:$0xff]   ;;  %v2391_v61 = vrot.slane %v104_v58, %v116_v55  ;;  %v112_v62 = vsub.s32 1, %v107_v54  ;;  %v109_v2 = vrot.slane %v104_v58, %v108_v56  ;;  %v2397_v3 = vrot.slane %v104_v58, %v120_v57  ;;  %s2178_s22 = smov [#allocation11]  }
  0x48   :  { %617 = vmatpush1.bf16.msra.mxu0 %v2238_v20  ;;  %658 = vmatpush1.bf16.msra.mxu1 %v2240_v21  ;;  %vm2177_vm1 = vmmov 0   ;;  %s1652_s23 = sshll.u32 %s2178_s22, 4  ;;  %s1653_s23 = int_to_ptr.vmem [resolvable:$true] %s1652_s23 }
  0x49   :  { %618 = vmatprep.subr.bf16.mxu0 %v2242_v22  ;;  %659 = vmatprep.subr.bf16.mxu1 %v2246_v23  ;;  %v113_v6 = vrot.slane %v104_v58, %v112_v62  ;;  %s2137_s24 = scalar_lea.vmem %s1653_s23, 128  ;;  %p2142_p7 = scmp.lt.s32.totalorder %s1653_s23, %s1653_s23 }
  0x4a   :  { %281 = vmatprep.mubr.bf16.mxu0 %v2780_v0  ;;  %354 = vmatprep.mubr.bf16.mxu1 %v2780_v0  ;;  %p2138_p6 = scmp.ne.s32.totalorder %s1653_s23, %s2137_s24  ;;  %p2143_p8 = scmp.lt.s32.totalorder %s2137_s24, %s2137_s24 }
  0x4c   :  { %619 = vmatpush1.bf16.msra.mxu0 %v2250_v24  ;;  %660 = vmatpush1.bf16.msra.mxu1 %v2254_v25  ;;  %p2144_p9 = por %p2143_p8, %p2142_p7 }
  0x4d   :  { %620 = vmatprep.subr.bf16.mxu0 %v2256_v26  ;;  %661 = vmatprep.subr.bf16.mxu1 %v2260_v27 }
  0x4e   :  { %p2145_p10 = pnand %p2144_p9, %p2138_p6 }
  0x4f   :  { %1691 = vmatmul.mubr.msk.bf16.gmra.mxu0 %vm226_vm0, %v1858_v28  ;;  %1695 = vmatmul.mubr.msk.bf16.gmra.mxu1 %vm226_vm0, %v1858_v28 }
  0x50   :  { %621 = vmatpush1.bf16.msra.mxu0 %v2264_v29  ;;  %662 = vmatpush1.bf16.msra.mxu1 %v2266_v30 }
  0x51   :  { %622 = vmatprep.subr.bf16.mxu0 %v2270_v31  ;;  %663 = vmatprep.subr.bf16.mxu1 %v2274_v32 }
  0x52   :  { %291 = vmatprep.mubr.bf16.mxu0 %v2780_v0  ;;  %364 = vmatprep.mubr.bf16.mxu1 %v2780_v0 }
  0x54   :  { %623 = vmatpush1.bf16.msra.mxu0 %v2278_v33  ;;  %664 = vmatpush1.bf16.msra.mxu1 %v2282_v34 }
  0x55   :  { %624 = vmatprep.subr.bf16.mxu0 %v2286_v35  ;;  %665 = vmatprep.subr.bf16.mxu1 %v2288_v36 }
  0x57   :  { %1692 = vmatmul.mubr.msk.bf16.gmra.mxu0 %vm226_vm0, %v1871_v37  ;;  %1696 = vmatmul.mubr.msk.bf16.gmra.mxu1 %vm226_vm0, %v1871_v37 }
  0x58   :  { %625 = vmatpush1.bf16.msra.mxu0 %v2292_v38  ;;  %666 = vmatpush1.bf16.msra.mxu1 %v2296_v39 }
  0x59   :  { %626 = vmatprep.subr.bf16.mxu0 %v2298_v40  ;;  %667 = vmatprep.subr.bf16.mxu1 %v2302_v41 }
  0x5a   :  { %301 = vmatprep.mubr.bf16.mxu0 %v2780_v0  ;;  %374 = vmatprep.mubr.bf16.mxu1 %v2780_v0 }
  0x5c   :  { %627 = vmatpush1.bf16.msra.mxu0 %v2308_v42  ;;  %668 = vmatpush1.bf16.msra.mxu1 %v2310_v43 }
  0x5d   :  { %628 = vmatprep.subr.bf16.mxu0 %v2314_v44  ;;  %669 = vmatprep.subr.bf16.mxu1 %v2316_v45 }
  0x5f   :  { %1693 = vmatmul.mubr.msk.bf16.gmra.mxu0 %vm226_vm0, %v1884_v46  ;;  %1697 = vmatmul.mubr.msk.bf16.gmra.mxu1 %vm226_vm0, %v1884_v46 }
  0x60   :  { %629 = vmatpush1.bf16.msra.mxu0 %v2322_v47  ;;  %670 = vmatpush1.bf16.msra.mxu1 %v2324_v48 }
  0x61   :  { %630 = vmatprep.subr.bf16.mxu0 %v2328_v49  ;;  %671 = vmatprep.subr.bf16.mxu1 %v2330_v50 }
  0x62   :  { %648 = vmatprep.mubr.bf16.mxu0 %v2780_v0  ;;  %689 = vmatprep.mubr.bf16.mxu1 %v2780_v0 }
  0x64   :  { %631 = vmatpush1.bf16.msra.mxu0 %v2336_v51  ;;  %672 = vmatpush1.bf16.msra.mxu1 %v2338_v52 }
  0x65   :  { %734 = vmatprep.subr.bf16.mxu0 %v2234_v17  ;;  %775 = vmatprep.subr.bf16.mxu1 %v2236_v18 }
  0x67   :  { %649 = vmatmul.mubr.bf16.vlgmr.msra.gmra.mxu0 %v2780_v0  ;;  %690 = vmatmul.mubr.bf16.vlgmr.msra.gmra.mxu1 %v2780_v0 }
  0x68   :  { %735 = vmatpush1.bf16.msra.mxu0 %v2238_v20  ;;  %776 = vmatpush1.bf16.msra.mxu1 %v2240_v21 }
  0x69   :  { %736 = vmatprep.subr.bf16.mxu0 %v2242_v22  ;;  %777 = vmatprep.subr.bf16.mxu1 %v2246_v23 }
  0x6a   :  { %766 = vmatprep.mubr.bf16.mxu0 %v2780_v0  ;;  %807 = vmatprep.mubr.bf16.mxu1 %v2780_v0 }
  0x6c   :  { %737 = vmatpush1.bf16.msra.mxu0 %v2250_v24  ;;  %778 = vmatpush1.bf16.msra.mxu1 %v2254_v25 }
  0x6d   :  { %738 = vmatprep.subr.bf16.mxu0 %v2256_v26  ;;  %779 = vmatprep.subr.bf16.mxu1 %v2260_v27 }
  0x70   :  { %739 = vmatpush1.bf16.msra.mxu0 %v2264_v29  ;;  %780 = vmatpush1.bf16.msra.mxu1 %v2266_v30 }
  0x71   :  { %740 = vmatprep.subr.bf16.mxu0 %v2270_v31  ;;  %781 = vmatprep.subr.bf16.mxu1 %v2274_v32 }
  0x74   :  { %741 = vmatpush1.bf16.msra.mxu0 %v2278_v33  ;;  %782 = vmatpush1.bf16.msra.mxu1 %v2282_v34 }
  0x75   :  { %742 = vmatprep.subr.bf16.mxu0 %v2286_v35  ;;  %783 = vmatprep.subr.bf16.mxu1 %v2288_v36 }
  0x78   :  { %743 = vmatpush1.bf16.msra.mxu0 %v2292_v38  ;;  %784 = vmatpush1.bf16.msra.mxu1 %v2296_v39 }
  0x79   :  { %744 = vmatprep.subr.bf16.mxu0 %v2298_v40  ;;  %785 = vmatprep.subr.bf16.mxu1 %v2302_v41 }
  0x7c   :  { %745 = vmatpush1.bf16.msra.mxu0 %v2308_v42  ;;  %786 = vmatpush1.bf16.msra.mxu1 %v2310_v43 }
  0x7d   :  { %746 = vmatprep.subr.bf16.mxu0 %v2314_v44  ;;  %787 = vmatprep.subr.bf16.mxu1 %v2316_v45 }
  0x80   :  { %747 = vmatpush1.bf16.msra.mxu0 %v2322_v47  ;;  %788 = vmatpush1.bf16.msra.mxu1 %v2324_v48 }
  0x81   :  { %748 = vmatprep.subr.bf16.mxu0 %v2328_v49  ;;  %789 = vmatprep.subr.bf16.mxu1 %v2330_v50 }
  0x84   :  { %749 = vmatpush1.bf16.msra.mxu0 %v2336_v51  ;;  %790 = vmatpush1.bf16.msra.mxu1 %v2338_v52 }
  0x85   :  { %852 = vmatprep.subr.bf16.mxu0 %v2234_v17  ;;  %893 = vmatprep.subr.bf16.mxu1 %v2236_v18 }
 0x107   :  { %v2387_v59 = vpop.f32.mrf.mxu0  ;;  %v2389_v60 = vpop.f32.mrf.mxu1 }
 0x109   :  { %v2393_v63 = vpop.f32.mrf.mxu0  ;;  %v2395_v1 = vpop.f32.mrf.mxu1 }
 0x10b   :  { %v277_v4 = vpop.f32.mrf.mxu0  ;;  %v350_v5 = vpop.f32.mrf.mxu1 }
 0x10c   :  { %v2399_v7 = vadd.f32 %v277_v4, %v109_v2  ;;  %v2402_v8 = vadd.f32 %v350_v5, %v2391_v61 }
 0x10d   :  { %v279_v9 = vpop.f32.mrf.mxu0  ;;  %v352_v10 = vpop.f32.mrf.mxu1 }
 0x10e   :  { %v2404_v11 = vadd.f32 %v279_v9, %v113_v6  ;;  %v2407_v12 = vadd.f32 %v352_v10, %v2397_v3 }
 0x10f   :  { %v283_v13 = vpop.f32.mrf.mxu0  ;;  %v356_v14 = vpop.f32.mrf.mxu1 }
 0x110   :  { %v2409_v15 = vadd.f32 %v283_v13, %v109_v2  ;;  %v2412_v16 = vadd.f32 %v356_v14, %v2391_v61 }
 0x111   :  { %v285_v19 = vpop.f32.mrf.mxu0  ;;  %v358_v28 = vpop.f32.mrf.mxu1 }
 0x112   :  { %2782 = vst [vmem:[#allocation16_spill] sm:$0xff] %v2412_v16  ;;  %v2414_v37 = vadd.f32 %v285_v19, %v113_v6  ;;  %v2417_v46 = vadd.f32 %v358_v28, %v2397_v3 }
 0x113   :  { %v287_v53 = vpop.f32.mrf.mxu0  ;;  %v360_v54 = vpop.f32.mrf.mxu1 }
 0x114   :  { %v2419_v55 = vadd.f32 %v287_v53, %v109_v2  ;;  %v2422_v56 = vadd.f32 %v360_v54, %v2391_v61 }
 0x115   :  { %v289_v57 = vpop.f32.mrf.mxu0  ;;  %v362_v58 = vpop.f32.mrf.mxu1 }
 0x116   :  { %2783 = vst [vmem:[#allocation17_spill] sm:$0xff] %v2419_v55  ;;  %2784 = vst [vmem:[#allocation18_spill] sm:$0xff] %v2422_v56  ;;  %v2424_v62 = vadd.f32 %v289_v57, %v113_v6  ;;  %v2427_v4 = vadd.f32 %v362_v58, %v2397_v3 }
 0x117   :  { %v293_v5 = vpop.f32.mrf.mxu0  ;;  %v366_v9 = vpop.f32.mrf.mxu1 }
 0x118   :  { %2785 = vst [vmem:[#allocation19_spill] sm:$0xff] %v2424_v62  ;;  %2786 = vst [vmem:[#allocation20_spill] sm:$0xff] %v2427_v4  ;;  %v2429_v10 = vadd.f32 %v293_v5, %v109_v2  ;;  %v2432_v13 = vadd.f32 %v366_v9, %v2391_v61 }
 0x119   :  { %v295_v14 = vpop.f32.mrf.mxu0  ;;  %v368_v19 = vpop.f32.mrf.mxu1 }
 0x11a   :  { %2787 = vst [vmem:[#allocation21_spill] sm:$0xff] %v2429_v10  ;;  %2788 = vst [vmem:[#allocation22_spill] sm:$0xff] %v2432_v13  ;;  %v2434_v28 = vadd.f32 %v295_v14, %v113_v6  ;;  %v2437_v53 = vadd.f32 %v368_v19, %v2397_v3 }
 0x11b   :  { %v297_v54 = vpop.f32.mrf.mxu0  ;;  %v370_v57 = vpop.f32.mrf.mxu1 }
 0x11c   :  { %2789 = vst [vmem:[#allocation23_spill] sm:$0xff] %v2434_v28  ;;  %2790 = vst [vmem:[#allocation24_spill] sm:$0xff] %v2437_v53  ;;  %v2439_v0 = vadd.f32 %v297_v54, %v109_v2  ;;  %v2442_v58 = vadd.f32 %v370_v57, %v2391_v61 }
 0x11d   :  { %v299_v56 = vpop.f32.mrf.mxu0  ;;  %v372_v5 = vpop.f32.mrf.mxu1 }
 0x11e   :  { %2791 = vst [vmem:[#allocation25_spill] sm:$0xff] %v2439_v0  ;;  %2792 = vst [vmem:[#allocation26_spill] sm:$0xff] %v2442_v58  ;;  %v2444_v10 = vadd.f32 %v299_v56, %v113_v6  ;;  %v2447_v9 = vadd.f32 %v372_v5, %v2397_v3 }
 0x11f   :  { %v303_v13 = vpop.f32.mrf.mxu0  ;;  %v376_v14 = vpop.f32.mrf.mxu1 }
 0x120   :  { %2793 = vst [vmem:[#allocation27_spill] sm:$0xff] %v2444_v10  ;;  %2794 = vst [vmem:[#allocation28_spill] sm:$0xff] %v2447_v9  ;;  %v2449_v28 = vadd.f32 %v303_v13, %v109_v2  ;;  %v2452_v19 = vadd.f32 %v376_v14, %v2391_v61 }
 0x121   :  { %v305_v53 = vpop.f32.mrf.mxu0  ;;  %v378_v54 = vpop.f32.mrf.mxu1 }
 0x122   :  { %2795 = vst [vmem:[#allocation29_spill] sm:$0xff] %v2449_v28  ;;  %2796 = vst [vmem:[#allocation30_spill] sm:$0xff] %v2452_v19  ;;  %v2454_v0 = vadd.f32 %v305_v53, %v113_v6  ;;  %v2457_v57 = vadd.f32 %v378_v54, %v2397_v3  ;;  %v274_v28 = vadd.f32 %v2387_v59, %v109_v2 }
 0x123   :  { %v307_v58 = vpop.f32.mrf.mxu0  ;;  %v380_v56 = vpop.f32.mrf.mxu1  ;;  %v276_v54 = vadd.f32 %v2393_v63, %v113_v6 }
 0x124   :  { %2797 = vst [vmem:[#allocation31_spill] sm:$0xff] %v2454_v0  ;;  %2798 = vst [vmem:[#allocation32_spill] sm:$0xff] %v2457_v57  ;;  %v2459_v10 = vadd.f32 %v307_v58, %v109_v2  ;;  %v2462_v5 = vadd.f32 %v380_v56, %v2391_v61  ;;  %v349_v2 = vadd.f32 %v2395_v1, %v2397_v3 }
 0x125   :  { %v309_v9 = vpop.f32.mrf.mxu0  ;;  %v382_v13 = vpop.f32.mrf.mxu1 }
 0x126   :  { %2799 = vst [vmem:[#allocation33_spill] sm:$0xff] %v2459_v10  ;;  %2800 = vst [vmem:[#allocation34_spill] sm:$0xff] %v2462_v5  ;;  %v2465_v14 = vadd.f32 %v309_v9, %v113_v6  ;;  %v2468_v19 = vadd.f32 %v382_v13, %v2397_v3  ;;  %v347_v13 = vadd.f32 %v2389_v60, %v2391_v61 }
 0x127   :  { %v650_v53 = vpop.f32.mrf.mxu0  ;;  %v691_v0 = vpop.f32.mrf.mxu1 }
 0x128   :  { %v698_v57 = vadd.f32 %v650_v53, %v274_v28  ;;  %v700_v28 = vadd.f32 %v691_v0, %v347_v13 }
 0x129   :  { %v652_v4 = vpop.f32.mrf.mxu0  ;;  %v693_v58 = vpop.f32.mrf.mxu1 }
 0x12a   :  { %v1730_v10 = vmul.f32 -1.442695, %v698_v57  ;;  %v699_v62 = vadd.f32 %v652_v4, %v276_v54  ;;  %v701_v9 = vadd.f32 %v693_v58, %v349_v2 }
 0x12b   :  { %v654_v56 = vpop.f32.mrf.mxu0  ;;  %v695_v5 = vpop.f32.mrf.mxu1 }
 0x12c   :  { %1897 = vpow2.f32 %v1730_v10  ;;  %v1731_v55 = vmul.f32 -1.442695, %v699_v62  ;;  %v1732_v63 = vmul.f32 -1.442695, %v701_v9  ;;  %v2801_v56 = vmov 0  }
 0x12d   :  { %v655_v16 = vpop.f32.mrf.mxu0  ;;  %v696_v59 = vpop.f32.mrf.mxu1 }
 0x12e   :  { %1899 = vpow2.f32 %v1731_v55 }
 0x12f   :  { %1901 = vpow2.f32 %v1732_v63 }
 0x139   :  { %v1898_v6 = vpop.eup %1897 }
 0x13a   :  { %v705_v53 = vadd.f32 1.0, %v1898_v6 }
 0x13b   :  { %v1900_v57 = vpop.eup %1899 }
 0x13c   :  { %1903 = vrcp.f32 %v705_v53  ;;  %v711_v4 = vadd.f32 1.0, %v1900_v57  ;;  %v1902_v16 = vpop.eup %1901 }
 0x13d   :  { %1905 = vtanh.f32 %v700_v28  ;;  %v718_v5 = vadd.f32 1.0, %v1902_v16 }
 0x13e   :  { %1907 = vrcp.f32 %v711_v4 }
 0x13f   :  { %1909 = vrcp.f32 %v718_v5 }
 0x149   :  { %v1904_v62 = vpop.eup %1903 }
 0x14a   :  { %v1906_v55 = vpop.eup %1905 }
 0x14b   :  { %v1908_v10 = vpop.eup %1907  ;;  %v722_v3 = vmul.f32 %v1906_v55, %v1904_v62 }
 0x14c   :  { %v721_v1 = vmul.f32 0.0, %v1908_v10  ;;  %v1910_v0 = vpop.eup %1909 }
 0x14e   :  { %v2475_v54 = vadd.f32 %v722_v3, %v721_v1 }
 0x150   :  { %1911 = vtanh.f32 %v2475_v54 }
 0x15d   :  { %v1912_v60 = vpop.eup %1911 }
 0x15e   :  { %v725_v61 = vmul.f32 %v1912_v60, %v1910_v0 }
 0x160   :  { %v733_v58 = vpack.c.bf16 %v725_v61, %v725_v61 }
 0x162   :  { %767 = vmatmul.mubr.bf16.vlgmr.msra.gmra.mxu0 %v733_v58  ;;  %808 = vmatmul.mubr.bf16.vlgmr.msra.gmra.mxu1 %v733_v58 }
 0x163   :  { %853 = vmatpush1.bf16.msra.mxu0 %v2238_v20  ;;  %894 = vmatpush1.bf16.msra.mxu1 %v2240_v21 }
 0x164   :  { %854 = vmatprep.subr.bf16.mxu0 %v2242_v22  ;;  %895 = vmatprep.subr.bf16.mxu1 %v2246_v23 }
 0x165   :  { %884 = vmatprep.mubr.bf16.mxu0 %v2801_v56  ;;  %925 = vmatprep.mubr.bf16.mxu1 %v2801_v56 }
 0x167   :  { %855 = vmatpush1.bf16.msra.mxu0 %v2250_v24  ;;  %896 = vmatpush1.bf16.msra.mxu1 %v2254_v25 }
 0x168   :  { %856 = vmatprep.subr.bf16.mxu0 %v2256_v26  ;;  %897 = vmatprep.subr.bf16.mxu1 %v2260_v27 }
 0x16b   :  { %857 = vmatpush1.bf16.msra.mxu0 %v2264_v29  ;;  %898 = vmatpush1.bf16.msra.mxu1 %v2266_v30 }
 0x16c   :  { %858 = vmatprep.subr.bf16.mxu0 %v2270_v31  ;;  %899 = vmatprep.subr.bf16.mxu1 %v2274_v32 }
 0x16f   :  { %859 = vmatpush1.bf16.msra.mxu0 %v2278_v33  ;;  %900 = vmatpush1.bf16.msra.mxu1 %v2282_v34 }
 0x170   :  { %860 = vmatprep.subr.bf16.mxu0 %v2286_v35  ;;  %901 = vmatprep.subr.bf16.mxu1 %v2288_v36 }
 0x173   :  { %861 = vmatpush1.bf16.msra.mxu0 %v2292_v38  ;;  %902 = vmatpush1.bf16.msra.mxu1 %v2296_v39 }
 0x174   :  { %862 = vmatprep.subr.bf16.mxu0 %v2298_v40  ;;  %903 = vmatprep.subr.bf16.mxu1 %v2302_v41 }
 0x177   :  { %863 = vmatpush1.bf16.msra.mxu0 %v2308_v42  ;;  %904 = vmatpush1.bf16.msra.mxu1 %v2310_v43 }
 0x178   :  { %864 = vmatprep.subr.bf16.mxu0 %v2314_v44  ;;  %905 = vmatprep.subr.bf16.mxu1 %v2316_v45 }
 0x17b   :  { %865 = vmatpush1.bf16.msra.mxu0 %v2322_v47  ;;  %906 = vmatpush1.bf16.msra.mxu1 %v2324_v48 }
 0x17c   :  { %866 = vmatprep.subr.bf16.mxu0 %v2328_v49  ;;  %907 = vmatprep.subr.bf16.mxu1 %v2330_v50 }
 0x17f   :  { %867 = vmatpush1.bf16.msra.mxu0 %v2336_v51  ;;  %908 = vmatpush1.bf16.msra.mxu1 %v2338_v52 }
 0x180   :  { %970 = vmatprep.subr.bf16.mxu0 %v2234_v17  ;;  %1011 = vmatprep.subr.bf16.mxu1 %v2236_v18 }
 0x222   :  { %v768_v59 = vpop.f32.mrf.mxu0  ;;  %v809_v2 = vpop.f32.mrf.mxu1 }
 0x223   :  { %v816_v9 = vadd.f32 %v768_v59, %v2399_v7  ;;  %v818_v10 = vadd.f32 %v809_v2, %v2402_v8 }
 0x224   :  { %v770_v13 = vpop.f32.mrf.mxu0  ;;  %v811_v63 = vpop.f32.mrf.mxu1 }
 0x225   :  { %v1733_v6 = vmul.f32 -1.442695, %v816_v9  ;;  %v817_v28 = vadd.f32 %v770_v13, %v2404_v11  ;;  %v819_v55 = vadd.f32 %v811_v63, %v2407_v12 }
 0x226   :  { %v772_v53 = vpop.f32.mrf.mxu0  ;;  %v813_v57 = vpop.f32.mrf.mxu1 }
 0x227   :  { %1913 = vpow2.f32 %v1733_v6  ;;  %v1734_v4 = vmul.f32 -1.442695, %v817_v28  ;;  %v1735_v5 = vmul.f32 -1.442695, %v819_v55 }
 0x228   :  { %v773_v16 = vpop.f32.mrf.mxu0  ;;  %v814_v62 = vpop.f32.mrf.mxu1 }
 0x229   :  { %1915 = vpow2.f32 %v1734_v4 }
 0x22a   :  { %1917 = vtanh.f32 %v818_v10 }
 0x22b   :  { %1919 = vpow2.f32 %v1735_v5 }
 0x234   :  { %v1914_v1 = vpop.eup %1913 }
 0x235   :  { %v823_v3 = vadd.f32 1.0, %v1914_v1 }
 0x236   :  { %v1916_v7 = vpop.eup %1915 }
 0x237   :  { %1921 = vrcp.f32 %v823_v3  ;;  %v829_v0 = vadd.f32 1.0, %v1916_v7  ;;  %v1918_v11 = vpop.eup %1917 }
 0x238   :  { %v1920_v60 = vpop.eup %1919 }
 0x239   :  { %1923 = vrcp.f32 %v829_v0  ;;  %v836_v9 = vadd.f32 1.0, %v1920_v60  ;;  %v2802_v0 = vld [vmem:[#allocation16_spill] sm:$0xff] }
 0x23b   :  { %1925 = vrcp.f32 %v836_v9 }
 0x244   :  { %v1922_v61 = vpop.eup %1921 }
 0x245   :  { %v840_v58 = vmul.f32 %v1922_v61, %v1918_v11 }
 0x246   :  { %v1924_v59 = vpop.eup %1923 }
 0x247   :  { %v839_v13 = vmul.f32 %v1924_v59, %v2475_v54 }
 0x248   :  { %v1926_v8 = vpop.eup %1925 }
 0x249   :  { %v2517_v12 = vadd.f32 %v840_v58, %v839_v13 }
 0x24b   :  { %1927 = vtanh.f32 %v2517_v12 }
 0x258   :  { %v1928_v2 = vpop.eup %1927 }
 0x259   :  { %v843_v63 = vmul.f32 %v1928_v2, %v1926_v8 }
 0x25b   :  { %v851_v6 = vpack.c.bf16 %v843_v63, %v843_v63 }
 0x25d   :  { %885 = vmatmul.mubr.bf16.vlgmr.msra.gmra.mxu0 %v851_v6  ;;  %926 = vmatmul.mubr.bf16.vlgmr.msra.gmra.mxu1 %v851_v6 }
 0x25e   :  { %971 = vmatpush1.bf16.msra.mxu0 %v2238_v20  ;;  %1012 = vmatpush1.bf16.msra.mxu1 %v2240_v21 }
 0x25f   :  { %972 = vmatprep.subr.bf16.mxu0 %v2242_v22  ;;  %1013 = vmatprep.subr.bf16.mxu1 %v2246_v23 }
 0x260   :  { %1002 = vmatprep.mubr.bf16.mxu0 %v2801_v56  ;;  %1043 = vmatprep.mubr.bf16.mxu1 %v2801_v56 }
 0x262   :  { %973 = vmatpush1.bf16.msra.mxu0 %v2250_v24  ;;  %1014 = vmatpush1.bf16.msra.mxu1 %v2254_v25 }
 0x263   :  { %974 = vmatprep.subr.bf16.mxu0 %v2256_v26  ;;  %1015 = vmatprep.subr.bf16.mxu1 %v2260_v27 }
 0x266   :  { %975 = vmatpush1.bf16.msra.mxu0 %v2264_v29  ;;  %1016 = vmatpush1.bf16.msra.mxu1 %v2266_v30 }
 0x267   :  { %976 = vmatprep.subr.bf16.mxu0 %v2270_v31  ;;  %1017 = vmatprep.subr.bf16.mxu1 %v2274_v32 }
 0x26a   :  { %977 = vmatpush1.bf16.msra.mxu0 %v2278_v33  ;;  %1018 = vmatpush1.bf16.msra.mxu1 %v2282_v34 }
 0x26b   :  { %978 = vmatprep.subr.bf16.mxu0 %v2286_v35  ;;  %1019 = vmatprep.subr.bf16.mxu1 %v2288_v36 }
 0x26e   :  { %979 = vmatpush1.bf16.msra.mxu0 %v2292_v38  ;;  %1020 = vmatpush1.bf16.msra.mxu1 %v2296_v39 }
 0x26f   :  { %980 = vmatprep.subr.bf16.mxu0 %v2298_v40  ;;  %1021 = vmatprep.subr.bf16.mxu1 %v2302_v41 }
 0x272   :  { %981 = vmatpush1.bf16.msra.mxu0 %v2308_v42  ;;  %1022 = vmatpush1.bf16.msra.mxu1 %v2310_v43 }
 0x273   :  { %982 = vmatprep.subr.bf16.mxu0 %v2314_v44  ;;  %1023 = vmatprep.subr.bf16.mxu1 %v2316_v45 }
 0x276   :  { %983 = vmatpush1.bf16.msra.mxu0 %v2322_v47  ;;  %1024 = vmatpush1.bf16.msra.mxu1 %v2324_v48 }
 0x277   :  { %984 = vmatprep.subr.bf16.mxu0 %v2328_v49  ;;  %1025 = vmatprep.subr.bf16.mxu1 %v2330_v50 }
 0x27a   :  { %985 = vmatpush1.bf16.msra.mxu0 %v2336_v51  ;;  %1026 = vmatpush1.bf16.msra.mxu1 %v2338_v52 }
 0x27b   :  { %1088 = vmatprep.subr.bf16.mxu0 %v2234_v17  ;;  %1129 = vmatprep.subr.bf16.mxu1 %v2236_v18 }
 0x31d   :  { %v886_v54 = vpop.f32.mrf.mxu0  ;;  %v927_v28 = vpop.f32.mrf.mxu1 }
 0x31e   :  { %v934_v53 = vadd.f32 %v886_v54, %v2409_v15  ;;  %v936_v11 = vadd.f32 %v927_v28, %v2802_v0 }
 0x31f   :  { %v888_v57 = vpop.f32.mrf.mxu0  ;;  %v929_v4 = vpop.f32.mrf.mxu1 }
 0x320   :  { %v1736_v16 = vmul.f32 -1.442695, %v934_v53  ;;  %v935_v62 = vadd.f32 %v888_v57, %v2414_v37  ;;  %v937_v7 = vadd.f32 %v929_v4, %v2417_v46 }
 0x321   :  { %v890_v55 = vpop.f32.mrf.mxu0  ;;  %v931_v10 = vpop.f32.mrf.mxu1 }
 0x322   :  { %1929 = vpow2.f32 %v1736_v16  ;;  %v1737_v5 = vmul.f32 -1.442695, %v935_v62  ;;  %v1738_v60 = vmul.f32 -1.442695, %v937_v7  ;;  %v2803_v16 = vld [vmem:[#allocation17_spill] sm:$0xff] }
 0x323   :  { %v891_v1 = vpop.f32.mrf.mxu0  ;;  %v932_v3 = vpop.f32.mrf.mxu1 }
 0x324   :  { %1931 = vpow2.f32 %v1737_v5  ;;  %v2804_v1 = vld [vmem:[#allocation19_spill] sm:$0xff] }
 0x325   :  { %1933 = vtanh.f32 %v936_v11 }
 0x326   :  { %1935 = vpow2.f32 %v1738_v60 }
 0x32f   :  { %v1930_v61 = vpop.eup %1929 }
 0x330   :  { %v941_v58 = vadd.f32 1.0, %v1930_v61 }
 0x331   :  { %v1932_v15 = vpop.eup %1931 }
 0x332   :  { %1937 = vrcp.f32 %v941_v58  ;;  %v947_v59 = vadd.f32 1.0, %v1932_v15  ;;  %v1934_v37 = vpop.eup %1933  ;;  %v2805_v58 = vld [vmem:[#allocation20_spill] sm:$0xff]  ;;  %v2806_v15 = vld [vmem:[#allocation18_spill] sm:$0xff] }
 0x333   :  { %v1936_v9 = vpop.eup %1935 }
 0x334   :  { %1939 = vrcp.f32 %v947_v59  ;;  %v954_v63 = vadd.f32 1.0, %v1936_v9 }
 0x336   :  { %1941 = vrcp.f32 %v954_v63 }
 0x33f   :  { %v1938_v13 = vpop.eup %1937 }
 0x340   :  { %v958_v8 = vmul.f32 %v1938_v13, %v1934_v37 }
 0x341   :  { %v1940_v2 = vpop.eup %1939 }
 0x342   :  { %v957_v6 = vmul.f32 %v1940_v2, %v2517_v12 }
 0x343   :  { %v1942_v54 = vpop.eup %1941 }
 0x344   :  { %v2559_v46 = vadd.f32 %v958_v8, %v957_v6 }
 0x346   :  { %1943 = vtanh.f32 %v2559_v46 }
 0x353   :  { %v1944_v28 = vpop.eup %1943 }
 0x354   :  { %v961_v53 = vmul.f32 %v1944_v28, %v1942_v54 }
 0x356   :  { %v969_v57 = vpack.c.bf16 %v961_v53, %v961_v53 }
 0x358   :  { %1003 = vmatmul.mubr.bf16.vlgmr.msra.gmra.mxu0 %v969_v57  ;;  %1044 = vmatmul.mubr.bf16.vlgmr.msra.gmra.mxu1 %v969_v57 }
 0x359   :  { %1089 = vmatpush1.bf16.msra.mxu0 %v2238_v20  ;;  %1130 = vmatpush1.bf16.msra.mxu1 %v2240_v21 }
 0x35a   :  { %1090 = vmatprep.subr.bf16.mxu0 %v2242_v22  ;;  %1131 = vmatprep.subr.bf16.mxu1 %v2246_v23 }
 0x35b   :  { %1120 = vmatprep.mubr.bf16.mxu0 %v2801_v56  ;;  %1161 = vmatprep.mubr.bf16.mxu1 %v2801_v56 }
 0x35d   :  { %1091 = vmatpush1.bf16.msra.mxu0 %v2250_v24  ;;  %1132 = vmatpush1.bf16.msra.mxu1 %v2254_v25 }
 0x35e   :  { %1092 = vmatprep.subr.bf16.mxu0 %v2256_v26  ;;  %1133 = vmatprep.subr.bf16.mxu1 %v2260_v27 }
 0x361   :  { %1093 = vmatpush1.bf16.msra.mxu0 %v2264_v29  ;;  %1134 = vmatpush1.bf16.msra.mxu1 %v2266_v30 }
 0x362   :  { %1094 = vmatprep.subr.bf16.mxu0 %v2270_v31  ;;  %1135 = vmatprep.subr.bf16.mxu1 %v2274_v32 }
 0x365   :  { %1095 = vmatpush1.bf16.msra.mxu0 %v2278_v33  ;;  %1136 = vmatpush1.bf16.msra.mxu1 %v2282_v34 }
 0x366   :  { %1096 = vmatprep.subr.bf16.mxu0 %v2286_v35  ;;  %1137 = vmatprep.subr.bf16.mxu1 %v2288_v36 }
 0x369   :  { %1097 = vmatpush1.bf16.msra.mxu0 %v2292_v38  ;;  %1138 = vmatpush1.bf16.msra.mxu1 %v2296_v39 }
 0x36a   :  { %1098 = vmatprep.subr.bf16.mxu0 %v2298_v40  ;;  %1139 = vmatprep.subr.bf16.mxu1 %v2302_v41 }
 0x36d   :  { %1099 = vmatpush1.bf16.msra.mxu0 %v2308_v42  ;;  %1140 = vmatpush1.bf16.msra.mxu1 %v2310_v43 }
 0x36e   :  { %1100 = vmatprep.subr.bf16.mxu0 %v2314_v44  ;;  %1141 = vmatprep.subr.bf16.mxu1 %v2316_v45 }
 0x371   :  { %1101 = vmatpush1.bf16.msra.mxu0 %v2322_v47  ;;  %1142 = vmatpush1.bf16.msra.mxu1 %v2324_v48 }
 0x372   :  { %1102 = vmatprep.subr.bf16.mxu0 %v2328_v49  ;;  %1143 = vmatprep.subr.bf16.mxu1 %v2330_v50 }
 0x375   :  { %1103 = vmatpush1.bf16.msra.mxu0 %v2336_v51  ;;  %1144 = vmatpush1.bf16.msra.mxu1 %v2338_v52 }
 0x376   :  { %1206 = vmatprep.subr.bf16.mxu0 %v2234_v17  ;;  %1247 = vmatprep.subr.bf16.mxu1 %v2236_v18 }
 0x418   :  { %v1004_v12 = vpop.f32.mrf.mxu0  ;;  %v1045_v4 = vpop.f32.mrf.mxu1 }
 0x419   :  { %v1052_v62 = vadd.f32 %v1004_v12, %v2803_v16  ;;  %v1054_v18 = vadd.f32 %v1045_v4, %v2806_v15 }
 0x41a   :  { %v1006_v55 = vpop.f32.mrf.mxu0  ;;  %v1047_v10 = vpop.f32.mrf.mxu1 }
 0x41b   :  { %v1739_v5 = vmul.f32 -1.442695, %v1052_v62  ;;  %v1053_v3 = vadd.f32 %v1006_v55, %v2804_v1  ;;  %v1055_v17 = vadd.f32 %v1047_v10, %v2805_v58 }
 0x41c   :  { %v1008_v7 = vpop.f32.mrf.mxu0  ;;  %v1049_v0 = vpop.f32.mrf.mxu1 }
 0x41d   :  { %1945 = vpow2.f32 %v1739_v5  ;;  %v1740_v11 = vmul.f32 -1.442695, %v1053_v3  ;;  %v1741_v59 = vmul.f32 -1.442695, %v1055_v17 }
 0x41e   :  { %v1009_v60 = vpop.f32.mrf.mxu0  ;;  %v1050_v61 = vpop.f32.mrf.mxu1 }
 0x41f   :  { %1947 = vpow2.f32 %v1740_v11 }
 0x420   :  { %1949 = vtanh.f32 %v1054_v18 }
 0x421   :  { %1951 = vpow2.f32 %v1741_v59 }
 0x42a   :  { %v1946_v37 = vpop.eup %1945 }
 0x42b   :  { %v1059_v9 = vadd.f32 1.0, %v1946_v37 }
 0x42c   :  { %v1948_v13 = vpop.eup %1947 }
 0x42d   :  { %1953 = vrcp.f32 %v1059_v9  ;;  %v1065_v8 = vadd.f32 1.0, %v1948_v13  ;;  %v1950_v2 = vpop.eup %1949  ;;  %v2650_v13 = vld [vmem:[#allocation8 + $0xe0] ss:$16 sps:$4 sm:$0xff]  }
 0x42e   :  { %v1952_v63 = vpop.eup %1951 }
 0x42f   :  { %1955 = vrcp.f32 %v1065_v8  ;;  %v1072_v53 = vadd.f32 1.0, %v1952_v63  ;;  %v2653_v8 = vld [vmem:[#allocation8 + $0xe8] ss:$16 sps:$4 sm:$0xff]   ;;  %v2659_v63 = vld [vmem:[#allocation8 + $0xcc] ss:$16 sps:$4 sm:$0xff]  }
 0x431   :  { %1957 = vrcp.f32 %v1072_v53  ;;  %v2673_v53 = vld [vmem:[#allocation8 + $0xac] ss:$16 sps:$4 sm:$0xff]  }
 0x43a   :  { %v1954_v6 = vpop.eup %1953 }
 0x43b   :  { %v1076_v54 = vmul.f32 %v1954_v6, %v1950_v2  ;;  %v2656_v2 = vld [vmem:[#allocation8 + $0xc4] ss:$16 sps:$4 sm:$0xff]   ;;  %v2664_v6 = vld [vmem:[#allocation8 + $0xc0] ss:$16 sps:$4 sm:$0xff]  }
 0x43c   :  { %v1956_v28 = vpop.eup %1955 }
 0x43d   :  { %v1075_v57 = vmul.f32 %v1956_v28, %v2559_v46  ;;  %v2670_v28 = vld [vmem:[#allocation8 + $0xa4] ss:$16 sps:$4 sm:$0xff]  }
 0x43e   :  { %v1958_v4 = vpop.eup %1957 }
 0x43f   :  { %v2601_v12 = vadd.f32 %v1076_v54, %v1075_v57  ;;  %v2667_v54 = vld [vmem:[#allocation8 + $0xc8] ss:$16 sps:$4 sm:$0xff]   ;;  %v2676_v57 = vld [vmem:[#allocation8 + $0xa0] ss:$16 sps:$4 sm:$0xff]  }
 0x441   :  { %1959 = vtanh.f32 %v2601_v12 }
 0x44e   :  { %v1960_v16 = vpop.eup %1959 }
 0x44f   :  { %v1079_v62 = vmul.f32 %v1960_v16, %v1958_v4  ;;  %v2682_v4 = vld [vmem:[#allocation8 + $0x84] ss:$16 sps:$4 sm:$0xff]   ;;  %v2685_v16 = vld [vmem:[#allocation8 + $0x8c] ss:$16 sps:$4 sm:$0xff]  }
 0x451   :  { %v1087_v55 = vpack.c.bf16 %v1079_v62, %v1079_v62  ;;  %v2688_v62 = vld [vmem:[#allocation8 + $0x80] ss:$16 sps:$4 sm:$0xff]  }
 0x453   :  { %1121 = vmatmul.mubr.bf16.vlgmr.msra.gmra.mxu0 %v1087_v55  ;;  %1162 = vmatmul.mubr.bf16.vlgmr.msra.gmra.mxu1 %v1087_v55  ;;  %v2691_v55 = vld [vmem:[#allocation8 + $0x88] ss:$16 sps:$4 sm:$0xff]  }
 0x454   :  { %1207 = vmatpush1.bf16.msra.mxu0 %v2238_v20  ;;  %1248 = vmatpush1.bf16.msra.mxu1 %v2240_v21  ;;  %v2636_v20 = vld [vmem:[#allocation8 + $0xe4] ss:$16 sps:$4 sm:$0xff]   ;;  %v2639_v21 = vld [vmem:[#allocation8 + $0xec] ss:$16 sps:$4 sm:$0xff]  }
 0x455   :  { %1208 = vmatprep.subr.bf16.mxu0 %v2242_v22  ;;  %1249 = vmatprep.subr.bf16.mxu1 %v2246_v23 }
 0x456   :  { %1238 = vmatprep.mubr.bf16.mxu0 %v2801_v56  ;;  %1279 = vmatprep.mubr.bf16.mxu1 %v2801_v56 }
 0x458   :  { %1209 = vmatpush1.bf16.msra.mxu0 %v2250_v24  ;;  %1250 = vmatpush1.bf16.msra.mxu1 %v2254_v25  ;;  %v2807_v24 = vld [vmem:[#allocation21_spill] sm:$0xff] }
 0x459   :  { %1210 = vmatprep.subr.bf16.mxu0 %v2256_v26  ;;  %1251 = vmatprep.subr.bf16.mxu1 %v2260_v27 }
 0x45c   :  { %1211 = vmatpush1.bf16.msra.mxu0 %v2264_v29  ;;  %1252 = vmatpush1.bf16.msra.mxu1 %v2266_v30  ;;  %v2808_v30 = vld [vmem:[#allocation23_spill] sm:$0xff] }
 0x45d   :  { %1212 = vmatprep.subr.bf16.mxu0 %v2270_v31  ;;  %1253 = vmatprep.subr.bf16.mxu1 %v2274_v32 }
 0x460   :  { %1213 = vmatpush1.bf16.msra.mxu0 %v2278_v33  ;;  %1254 = vmatpush1.bf16.msra.mxu1 %v2282_v34 }
 0x461   :  { %1214 = vmatprep.subr.bf16.mxu0 %v2286_v35  ;;  %1255 = vmatprep.subr.bf16.mxu1 %v2288_v36 }
 0x464   :  { %1215 = vmatpush1.bf16.msra.mxu0 %v2292_v38  ;;  %1256 = vmatpush1.bf16.msra.mxu1 %v2296_v39  ;;  %v2809_v38 = vld [vmem:[#allocation24_spill] sm:$0xff] }
 0x465   :  { %1216 = vmatprep.subr.bf16.mxu0 %v2298_v40  ;;  %1257 = vmatprep.subr.bf16.mxu1 %v2302_v41  ;;  %v2810_v40 = vld [vmem:[#allocation22_spill] sm:$0xff] }
 0x468   :  { %1217 = vmatpush1.bf16.msra.mxu0 %v2308_v42  ;;  %1258 = vmatpush1.bf16.msra.mxu1 %v2310_v43 }
 0x469   :  { %1218 = vmatprep.subr.bf16.mxu0 %v2314_v44  ;;  %1259 = vmatprep.subr.bf16.mxu1 %v2316_v45 }
 0x46c   :  { %1219 = vmatpush1.bf16.msra.mxu0 %v2322_v47  ;;  %1260 = vmatpush1.bf16.msra.mxu1 %v2324_v48 }
 0x46d   :  { %1220 = vmatprep.subr.bf16.mxu0 %v2328_v49  ;;  %1261 = vmatprep.subr.bf16.mxu1 %v2330_v50 }
 0x470   :  { %1221 = vmatpush1.bf16.msra.mxu0 %v2336_v51  ;;  %1262 = vmatpush1.bf16.msra.mxu1 %v2338_v52 }
 0x471   :  { %1324 = vmatprep.subr.bf16.mxu0 %v2636_v20  ;;  %1365 = vmatprep.subr.bf16.mxu1 %v2639_v21 }
 0x513   :  { %v1122_v22 = vpop.f32.mrf.mxu0  ;;  %v1163_v23 = vpop.f32.mrf.mxu1 }
 0x514   :  { %v1170_v25 = vadd.f32 %v1122_v22, %v2807_v24  ;;  %v1172_v41 = vadd.f32 %v1163_v23, %v2810_v40  ;;  %v2694_v22 = vld [vmem:[#allocation8 + $0x64] ss:$16 sps:$4 sm:$0xff]   ;;  %v2697_v23 = vld [vmem:[#allocation8 + $0x6c] ss:$16 sps:$4 sm:$0xff]   ;;  %v2700_v24 = vld [vmem:[#allocation8 + $0x60] ss:$16 sps:$4 sm:$0xff]  }
 0x515   :  { %v1124_v26 = vpop.f32.mrf.mxu0  ;;  %v1165_v27 = vpop.f32.mrf.mxu1 }
 0x516   :  { %v1742_v29 = vmul.f32 -1.442695, %v1170_v25  ;;  %v1171_v31 = vadd.f32 %v1124_v26, %v2808_v30  ;;  %v1173_v39 = vadd.f32 %v1165_v27, %v2809_v38  ;;  %v2703_v25 = vld [vmem:[#allocation8 + $0x68] ss:$16 sps:$4 sm:$0xff]   ;;  %v2706_v26 = vld [vmem:[#allocation8 + $0x44] ss:$16 sps:$4 sm:$0xff]  }
 0x517   :  { %v1126_v32 = vpop.f32.mrf.mxu0  ;;  %v1167_v33 = vpop.f32.mrf.mxu1  ;;  %v2709_v27 = vld [vmem:[#allocation8 + $0x4c] ss:$16 sps:$4 sm:$0xff]  }
 0x518   :  { %1961 = vpow2.f32 %v1742_v29  ;;  %v1743_v34 = vmul.f32 -1.442695, %v1171_v31  ;;  %v1744_v46 = vmul.f32 -1.442695, %v1173_v39 }
 0x519   :  { %v1127_v35 = vpop.f32.mrf.mxu0  ;;  %v1168_v36 = vpop.f32.mrf.mxu1 }
 0x51a   :  { %1963 = vpow2.f32 %v1743_v34  ;;  %v2814_v34 = vld [vmem:[#allocation26_spill] sm:$0xff] }
 0x51b   :  { %1965 = vtanh.f32 %v1172_v41 }
 0x51c   :  { %1967 = vpow2.f32 %v1744_v46 }
 0x525   :  { %v1962_v10 = vpop.eup %1961 }
 0x526   :  { %v1177_v5 = vadd.f32 1.0, %v1962_v10 }
 0x527   :  { %v1964_v1 = vpop.eup %1963 }
 0x528   :  { %1969 = vrcp.f32 %v1177_v5  ;;  %v1183_v3 = vadd.f32 1.0, %v1964_v1  ;;  %v1966_v7 = vpop.eup %1965 }
 0x529   :  { %v1968_v0 = vpop.eup %1967 }
 0x52a   :  { %1971 = vrcp.f32 %v1183_v3  ;;  %v1190_v58 = vadd.f32 1.0, %v1968_v0 }
 0x52c   :  { %1973 = vrcp.f32 %v1190_v58 }
 0x535   :  { %v1970_v11 = vpop.eup %1969 }
 0x536   :  { %v1194_v60 = vmul.f32 %v1970_v11, %v1966_v7 }
 0x537   :  { %v1972_v61 = vpop.eup %1971 }
 0x538   :  { %v1193_v17 = vmul.f32 %v1972_v61, %v2601_v12  ;;  %v2679_v12 = vld [vmem:[#allocation8 + $0xa8] ss:$16 sps:$4 sm:$0xff]  }
 0x539   :  { %v1974_v18 = vpop.eup %1973 }
 0x53a   :  { %v2647_v15 = vadd.f32 %v1194_v60, %v1193_v17  ;;  %v2048_v17 = vld [vmem:[#allocation8 + $0x48] ss:$16 sps:$4 sm:$0xff]  }
 0x53c   :  { %1975 = vtanh.f32 %v2647_v15 }
 0x549   :  { %v1976_v59 = vpop.eup %1975 }
 0x54a   :  { %v1197_v37 = vmul.f32 %v1976_v59, %v1974_v18  ;;  %v2050_v18 = vld [vmem:[#allocation8 + $0x2c] ss:$16 sps:$4 sm:$0xff]   ;;  %v2051_v59 = vld [vmem:[#allocation8 + $0x20] ss:$16 sps:$4 sm:$0xff]  }
 0x54c   :  { %v1205_v9 = vpack.c.bf16 %v1197_v37, %v1197_v37  ;;  %v2052_v37 = vld [vmem:[#allocation8 + $0x28] ss:$16 sps:$4 sm:$0xff]  }
 0x54e   :  { %1239 = vmatmul.mubr.bf16.vlgmr.msra.gmra.mxu0 %v1205_v9  ;;  %1280 = vmatmul.mubr.bf16.vlgmr.msra.gmra.mxu1 %v1205_v9  ;;  %v2053_v9 = vld [vmem:[#allocation8 + $0x4] ss:$16 sps:$4 sm:$0xff]  }
 0x54f   :  { %1325 = vmatpush1.bf16.msra.mxu0 %v2650_v13  ;;  %1366 = vmatpush1.bf16.msra.mxu1 %v2653_v8 }
 0x550   :  { %1326 = vmatprep.subr.bf16.mxu0 %v2656_v2  ;;  %1367 = vmatprep.subr.bf16.mxu1 %v2659_v63 }
 0x551   :  { %1356 = vmatprep.mubr.bf16.mxu0 %v2801_v56  ;;  %1397 = vmatprep.mubr.bf16.mxu1 %v2801_v56 }
 0x553   :  { %1327 = vmatpush1.bf16.msra.mxu0 %v2664_v6  ;;  %1368 = vmatpush1.bf16.msra.mxu1 %v2667_v54 }
 0x554   :  { %1328 = vmatprep.subr.bf16.mxu0 %v2670_v28  ;;  %1369 = vmatprep.subr.bf16.mxu1 %v2673_v53 }
 0x557   :  { %1329 = vmatpush1.bf16.msra.mxu0 %v2676_v57  ;;  %1370 = vmatpush1.bf16.msra.mxu1 %v2679_v12 }
 0x558   :  { %1330 = vmatprep.subr.bf16.mxu0 %v2682_v4  ;;  %1371 = vmatprep.subr.bf16.mxu1 %v2685_v16 }
 0x55b   :  { %1331 = vmatpush1.bf16.msra.mxu0 %v2688_v62  ;;  %1372 = vmatpush1.bf16.msra.mxu1 %v2691_v55 }
 0x55c   :  { %1332 = vmatprep.subr.bf16.mxu0 %v2694_v22  ;;  %1373 = vmatprep.subr.bf16.mxu1 %v2697_v23 }
 0x55f   :  { %1333 = vmatpush1.bf16.msra.mxu0 %v2700_v24  ;;  %1374 = vmatpush1.bf16.msra.mxu1 %v2703_v25 }
 0x560   :  { %1334 = vmatprep.subr.bf16.mxu0 %v2706_v26  ;;  %1375 = vmatprep.subr.bf16.mxu1 %v2709_v27 }
 0x563   :  { %1335 = vmatpush1.bf16.msra.mxu0 %v2308_v42  ;;  %1376 = vmatpush1.bf16.msra.mxu1 %v2310_v43 }
 0x564   :  { %1336 = vmatprep.subr.bf16.mxu0 %v2314_v44  ;;  %1377 = vmatprep.subr.bf16.mxu1 %v2316_v45  ;;  %v2811_v44 = vld [vmem:[#allocation25_spill] sm:$0xff] }
 0x567   :  { %1337 = vmatpush1.bf16.msra.mxu0 %v2322_v47  ;;  %1378 = vmatpush1.bf16.msra.mxu1 %v2324_v48  ;;  %v2812_v48 = vld [vmem:[#allocation27_spill] sm:$0xff] }
 0x568   :  { %1338 = vmatprep.subr.bf16.mxu0 %v2328_v49  ;;  %1379 = vmatprep.subr.bf16.mxu1 %v2330_v50 }
 0x56b   :  { %1339 = vmatpush1.bf16.msra.mxu0 %v2336_v51  ;;  %1380 = vmatpush1.bf16.msra.mxu1 %v2338_v52  ;;  %v2813_v52 = vld [vmem:[#allocation28_spill] sm:$0xff] }
 0x56c   :  { %1442 = vmatprep.subr.bf16.mxu0 %v2636_v20  ;;  %1483 = vmatprep.subr.bf16.mxu1 %v2639_v21 }
 0x60e   :  { %v1240_v42 = vpop.f32.mrf.mxu0  ;;  %v1281_v43 = vpop.f32.mrf.mxu1 }
 0x60f   :  { %v1288_v45 = vadd.f32 %v1240_v42, %v2811_v44  ;;  %v1290_v21 = vadd.f32 %v1281_v43, %v2814_v34 }
 0x610   :  { %v1242_v29 = vpop.f32.mrf.mxu0  ;;  %v1283_v47 = vpop.f32.mrf.mxu1 }
 0x611   :  { %v1745_v30 = vmul.f32 -1.442695, %v1288_v45  ;;  %v1289_v31 = vadd.f32 %v1242_v29, %v2812_v48  ;;  %v1291_v20 = vadd.f32 %v1283_v47, %v2813_v52 }
 0x612   :  { %v1244_v49 = vpop.f32.mrf.mxu0  ;;  %v1285_v32 = vpop.f32.mrf.mxu1 }
 0x613   :  { %1977 = vpow2.f32 %v1745_v30  ;;  %v1746_v50 = vmul.f32 -1.442695, %v1289_v31  ;;  %v1747_v35 = vmul.f32 -1.442695, %v1291_v20 }
 0x614   :  { %v1245_v51 = vpop.f32.mrf.mxu0  ;;  %v1286_v33 = vpop.f32.mrf.mxu1 }
 0x615   :  { %1979 = vpow2.f32 %v1746_v50 }
 0x616   :  { %1981 = vtanh.f32 %v1290_v21 }
 0x617   :  { %1983 = vpow2.f32 %v1747_v35  ;;  %v2176_v35 = vmov 0.0  }
 0x620   :  { %v1978_v36 = vpop.eup %1977 }
 0x621   :  { %v1295_v38 = vadd.f32 1.0, %v1978_v36  ;;  %v1567_v36 = vld [vmem:[#allocation9 + $0x78] sm:$0xff] }
 0x622   :  { %v1980_v39 = vpop.eup %1979 }
 0x623   :  { %1985 = vrcp.f32 %v1295_v38  ;;  %v1301_v40 = vadd.f32 1.0, %v1980_v39  ;;  %v1982_v41 = vpop.eup %1981  ;;  %v1566_v38 = vld [vmem:[#allocation9 + $0x70] sm:$0xff]  ;;  %v1565_v39 = vld [vmem:[#allocation9 + $0x68] sm:$0xff] }
 0x624   :  { %v1984_v46 = vpop.eup %1983 }
 0x625   :  { %1987 = vrcp.f32 %v1301_v40  ;;  %v1308_v3 = vadd.f32 1.0, %v1984_v46  ;;  %v1564_v40 = vld [vmem:[#allocation9 + $0x60] sm:$0xff]  ;;  %v1562_v46 = vld [vmem:[#allocation9 + $0x50] sm:$0xff] }
 0x627   :  { %1989 = vrcp.f32 %v1308_v3  ;;  %v1558_v3 = vld [vmem:[#allocation9 + $0x30] sm:$0xff] }
 0x630   :  { %v1986_v10 = vpop.eup %1985 }
 0x631   :  { %v1312_v5 = vmul.f32 %v1986_v10, %v1982_v41  ;;  %v1563_v41 = vld [vmem:[#allocation9 + $0x58] sm:$0xff]  ;;  %v1561_v10 = vld [vmem:[#allocation9 + $0x48] sm:$0xff] }
 0x632   :  { %v1988_v1 = vpop.eup %1987 }
 0x633   :  { %v1311_v7 = vmul.f32 %v1988_v1, %v2647_v15  ;;  %v2049_v15 = vld [vmem:[#allocation8 + $0x24] ss:$16 sps:$4 sm:$0xff]   ;;  %v1559_v1 = vld [vmem:[#allocation9 + $0x38] sm:$0xff] }
 0x634   :  { %v1990_v11 = vpop.eup %1989 }
 0x635   :  { %v2729_v0 = vadd.f32 %v1312_v5, %v1311_v7  ;;  %v1560_v5 = vld [vmem:[#allocation9 + $0x40] sm:$0xff]  ;;  %v1557_v7 = vld [vmem:[#allocation9 + $0x28] sm:$0xff] }
 0x637   :  { %1991 = vtanh.f32 %v2729_v0 }
 0x644   :  { %v1992_v60 = vpop.eup %1991 }
 0x645   :  { %v1315_v61 = vmul.f32 %v1992_v60, %v1990_v11  ;;  %v1555_v11 = vld [vmem:[#allocation9 + $0x18] sm:$0xff]  ;;  %v1554_v60 = vld [vmem:[#allocation9 + $0x10] sm:$0xff] }
 0x647   :  { %v1323_v58 = vpack.c.bf16 %v1315_v61, %v1315_v61  ;;  %v1553_v61 = vld [vmem:[#allocation9 + $0x8] sm:$0xff] }
 0x649   :  { %1357 = vmatmul.mubr.bf16.vlgmr.msra.gmra.mxu0 %v1323_v58  ;;  %1398 = vmatmul.mubr.bf16.vlgmr.msra.gmra.mxu1 %v1323_v58  ;;  %v1552_v58 = vld [vmem:[#allocation9] sm:$0xff] }
 0x64a   :  { %1443 = vmatpush1.bf16.msra.mxu0 %v2650_v13  ;;  %1484 = vmatpush1.bf16.msra.mxu1 %v2653_v8  ;;  %v2054_v13 = vld [vmem:[#allocation8 + $0xc] ss:$16 sps:$4 sm:$0xff]   ;;  %v2055_v8 = vld [vmem:[#allocation8] ss:$16 sps:$4 sm:$0xff]  }
 0x64b   :  { %1444 = vmatprep.subr.bf16.mxu0 %v2656_v2  ;;  %1485 = vmatprep.subr.bf16.mxu1 %v2659_v63  ;;  %v2056_v2 = vld [vmem:[#allocation8 + $0x8] ss:$16 sps:$4 sm:$0xff]  }
 0x64c   :  { %1474 = vmatprep.mubr.bf16.mxu0 %v2801_v56  ;;  %1515 = vmatprep.mubr.bf16.mxu1 %v2801_v56  ;;  %v2047_v56 = vld [vmem:[#allocation8 + $0x40] ss:$16 sps:$4 sm:$0xff]  }
 0x64e   :  { %1445 = vmatpush1.bf16.msra.mxu0 %v2664_v6  ;;  %1486 = vmatpush1.bf16.msra.mxu1 %v2667_v54  ;;  %v2815_v54 = vld [vmem:[#allocation29_spill] sm:$0xff] }
 0x64f   :  { %1446 = vmatprep.subr.bf16.mxu0 %v2670_v28  ;;  %1487 = vmatprep.subr.bf16.mxu1 %v2673_v53 }
 0x652   :  { %1447 = vmatpush1.bf16.msra.mxu0 %v2676_v57  ;;  %1488 = vmatpush1.bf16.msra.mxu1 %v2679_v12 }
 0x653   :  { %1448 = vmatprep.subr.bf16.mxu0 %v2682_v4  ;;  %1489 = vmatprep.subr.bf16.mxu1 %v2685_v16  ;;  %v2816_v4 = vld [vmem:[#allocation31_spill] sm:$0xff] }
 0x656   :  { %1449 = vmatpush1.bf16.msra.mxu0 %v2688_v62  ;;  %1490 = vmatpush1.bf16.msra.mxu1 %v2691_v55 }
 0x657   :  { %1450 = vmatprep.subr.bf16.mxu0 %v2694_v22  ;;  %1491 = vmatprep.subr.bf16.mxu1 %v2697_v23 }
 0x65a   :  { %1451 = vmatpush1.bf16.msra.mxu0 %v2700_v24  ;;  %1492 = vmatpush1.bf16.msra.mxu1 %v2703_v25  ;;  %v2817_v25 = vld [vmem:[#allocation32_spill] sm:$0xff] }
 0x65b   :  { %1452 = vmatprep.subr.bf16.mxu0 %v2706_v26  ;;  %1493 = vmatprep.subr.bf16.mxu1 %v2709_v27  ;;  %v2818_v27 = vld [vmem:[#allocation30_spill] sm:$0xff] }
 0x65e   :  { %1453 = vmatpush1.bf16.msra.mxu0 %v2047_v56  ;;  %1494 = vmatpush1.bf16.msra.mxu1 %v2048_v17 }
 0x65f   :  { %1454 = vmatprep.subr.bf16.mxu0 %v2049_v15  ;;  %1495 = vmatprep.subr.bf16.mxu1 %v2050_v18  ;;  %v2819_v15 = vld [vmem:[#allocation33_spill] sm:$0xff] }
 0x662   :  { %1455 = vmatpush1.bf16.msra.mxu0 %v2051_v59  ;;  %1496 = vmatpush1.bf16.msra.mxu1 %v2052_v37 }
 0x663   :  { %1456 = vmatprep.subr.bf16.mxu0 %v2053_v9  ;;  %1497 = vmatprep.subr.bf16.mxu1 %v2054_v13 }
 0x666   :  { %1457 = vmatpush1.bf16.msra.mxu0 %v2055_v8  ;;  %1498 = vmatpush1.bf16.msra.mxu1 %v2056_v2 }
 0x667   :  { %1772 = vmatprep.subr.mxu0 %v2176_v35 }
 0x709   :  { %v1358_v63 = vpop.f32.mrf.mxu0  ;;  %v1399_v6 = vpop.f32.mrf.mxu1 }
 0x70a   :  { %v1406_v28 = vadd.f32 %v1358_v63, %v2815_v54  ;;  %v1408_v42 = vadd.f32 %v1399_v6, %v2818_v27 }
 0x70b   :  { %v1360_v53 = vpop.f32.mrf.mxu0  ;;  %v1401_v57 = vpop.f32.mrf.mxu1 }
 0x70c   :  { %v1748_v12 = vmul.f32 -1.442695, %v1406_v28  ;;  %v1407_v16 = vadd.f32 %v1360_v53, %v2816_v4  ;;  %v1409_v26 = vadd.f32 %v1401_v57, %v2817_v25  ;;  %v2820_v53 = vld [vmem:[#allocation34_spill] sm:$0xff] }
 0x70d   :  { %v1362_v62 = vpop.f32.mrf.mxu0  ;;  %v1403_v55 = vpop.f32.mrf.mxu1 }
 0x70e   :  { %1993 = vpow2.f32 %v1748_v12  ;;  %v1749_v22 = vmul.f32 -1.442695, %v1407_v16  ;;  %v1750_v43 = vmul.f32 -1.442695, %v1409_v26 }
 0x70f   :  { %v1363_v23 = vpop.f32.mrf.mxu0  ;;  %v1404_v24 = vpop.f32.mrf.mxu1 }
 0x710   :  { %1995 = vpow2.f32 %v1749_v22 }
 0x711   :  { %1997 = vtanh.f32 %v1408_v42 }
 0x712   :  { %1999 = vpow2.f32 %v1750_v43 }
 0x71b   :  { %v1994_v44 = vpop.eup %1993 }
 0x71c   :  { %v1413_v45 = vadd.f32 1.0, %v1994_v44 }
 0x71d   :  { %v1996_v29 = vpop.eup %1995 }
 0x71e   :  { %2001 = vrcp.f32 %v1413_v45  ;;  %v1419_v47 = vadd.f32 1.0, %v1996_v29  ;;  %v1998_v30 = vpop.eup %1997  ;;  %v1754_v45 = vld [vmem:[%s2778_s5] ss:$0 sm:$0xff] }
 0x71f   :  { %v2000_v48 = vpop.eup %1999 }
 0x720   :  { %2003 = vrcp.f32 %v1419_v47  ;;  %v1426_v50 = vadd.f32 1.0, %v2000_v48 }
 0x722   :  { %2005 = vrcp.f32 %v1426_v50 }
 0x72b   :  { %v2002_v31 = vpop.eup %2001 }
 0x72c   :  { %v1430_v49 = vmul.f32 %v2002_v31, %v1998_v30 }
 0x72d   :  { %v2004_v32 = vpop.eup %2003 }
 0x72e   :  { %v1429_v51 = vmul.f32 %v2004_v32, %v2729_v0  ;;  %v1556_v0 = vld [vmem:[#allocation9 + $0x20] sm:$0xff] }
 0x72f   :  { %v2006_v52 = vpop.eup %2005 }
 0x730   :  { %v2759_v33 = vadd.f32 %v1430_v49, %v1429_v51 }
 0x732   :  { %2007 = vtanh.f32 %v2759_v33 }
 0x73f   :  { %v2008_v20 = vpop.eup %2007 }
 0x740   :  { %v1433_v34 = vmul.f32 %v2008_v20, %v2006_v52 }
 0x742   :  { %v1441_v21 = vpack.c.bf16 %v1433_v34, %v1433_v34 }
 0x744   :  { %1475 = vmatmul.mubr.bf16.vlgmr.msra.gmra.mxu0 %v1441_v21  ;;  %1516 = vmatmul.mubr.bf16.vlgmr.msra.gmra.mxu1 %v1441_v21 }
 0x745   :  { %1773 = vmatpush3.msra.mxu0 %v1567_v36  ;;  %1804 = vmatprep.mubr.msk.f32.mxu0 %vm2177_vm1, %v2176_v35 }
 0x746   :  { %1774 = vmatprep.subr.mxu0 %v2176_v35 }
 0x747   :  { %1775 = vmatpush3.msra.mxu0 %v1566_v38 }
 0x748   :  { %1776 = vmatprep.subr.mxu0 %v2176_v35 }
 0x749   :  { %1777 = vmatpush3.msra.mxu0 %v1565_v39 }
 0x74a   :  { %1778 = vmatprep.subr.mxu0 %v2176_v35 }
 0x74b   :  { %1779 = vmatpush3.msra.mxu0 %v1564_v40 }
 0x74c   :  { %1780 = vmatprep.subr.mxu0 %v2176_v35 }
 0x74d   :  { %1781 = vmatpush3.msra.mxu0 %v1563_v41 }
 0x74e   :  { %1782 = vmatprep.subr.mxu0 %v2176_v35 }
 0x74f   :  { %1783 = vmatpush3.msra.mxu0 %v1562_v46 }
 0x750   :  { %1784 = vmatprep.subr.mxu0 %v2176_v35 }
 0x751   :  { %1785 = vmatpush3.msra.mxu0 %v1561_v10 }
 0x752   :  { %1786 = vmatprep.subr.mxu0 %v2176_v35 }
 0x753   :  { %1787 = vmatpush3.msra.mxu0 %v1560_v5 }
 0x754   :  { %1788 = vmatprep.subr.mxu0 %v2176_v35 }
 0x755   :  { %1789 = vmatpush3.msra.mxu0 %v1559_v1 }
 0x756   :  { %1790 = vmatprep.subr.mxu0 %v2176_v35 }
 0x757   :  { %1791 = vmatpush3.msra.mxu0 %v1558_v3 }
 0x758   :  { %1792 = vmatprep.subr.mxu0 %v2176_v35 }
 0x759   :  { %1793 = vmatpush3.msra.mxu0 %v1557_v7 }
 0x75a   :  { %1794 = vmatprep.subr.mxu0 %v2176_v35 }
 0x75b   :  { %1795 = vmatpush3.msra.mxu0 %v1556_v0 }
 0x75c   :  { %1796 = vmatprep.subr.mxu0 %v2176_v35 }
 0x75d   :  { %1797 = vmatpush3.msra.mxu0 %v1555_v11 }
 0x75e   :  { %1798 = vmatprep.subr.mxu0 %v2176_v35 }
 0x75f   :  { %1799 = vmatpush3.msra.mxu0 %v1554_v60 }
 0x760   :  { %1800 = vmatprep.subr.mxu0 %v2176_v35 }
 0x761   :  { %1801 = vmatpush3.msra.mxu0 %v1553_v61 }
 0x762   :  { %1802 = vmatprep.subr.mxu0 %v2176_v35 }
 0x763   :  { %1803 = vmatpush3.msra.mxu0 %v1552_v58 }
 0x804   :  { %v1476_v56 = vpop.f32.mrf.mxu0  ;;  %v1517_v17 = vpop.f32.mrf.mxu1 }
 0x805   :  { %v1524_v18 = vadd.f32 %v1476_v56, %v2819_v15  ;;  %v1526_v57 = vadd.f32 %v1517_v17, %v2820_v53 }
 0x806   :  { %v1478_v59 = vpop.f32.mrf.mxu0  ;;  %v1519_v37 = vpop.f32.mrf.mxu1 }
 0x807   :  { %v1751_v9 = vmul.f32 -1.442695, %v1524_v18  ;;  %v1525_v13 = vadd.f32 %v1478_v59, %v2465_v14  ;;  %v1527_v28 = vadd.f32 %v1519_v37, %v2468_v19 }
 0x808   :  { %v1480_v8 = vpop.f32.mrf.mxu0  ;;  %v1521_v2 = vpop.f32.mrf.mxu1 }
 0x809   :  { %2009 = vpow2.f32 %v1751_v9  ;;  %v1752_v63 = vmul.f32 -1.442695, %v1525_v13  ;;  %v1753_v12 = vmul.f32 -1.442695, %v1527_v28 }
 0x80a   :  { %v1481_v6 = vpop.f32.mrf.mxu0  ;;  %v1522_v54 = vpop.f32.mrf.mxu1 }
 0x80b   :  { %2011 = vpow2.f32 %v1752_v63 }
 0x80c   :  { %2013 = vtanh.f32 %v1526_v57 }
 0x80d   :  { %2015 = vpow2.f32 %v1753_v12 }
 0x816   :  { %v2010_v4 = vpop.eup %2009 }
 0x817   :  { %v1531_v16 = vadd.f32 1.0, %v2010_v4 }
 0x818   :  { %v2012_v62 = vpop.eup %2011 }
 0x819   :  { %2017 = vrcp.f32 %v1531_v16  ;;  %v1537_v55 = vadd.f32 1.0, %v2012_v62  ;;  %v2014_v14 = vpop.eup %2013 }
 0x81a   :  { %v2016_v22 = vpop.eup %2015 }
 0x81b   :  { %2019 = vrcp.f32 %v1537_v55  ;;  %v1544_v26 = vadd.f32 1.0, %v2016_v22 }
 0x81d   :  { %2021 = vrcp.f32 %v1544_v26 }
 0x826   :  { %v2018_v23 = vpop.eup %2017 }
 0x827   :  { %v1548_v24 = vmul.f32 %v2018_v23, %v2014_v14 }
 0x828   :  { %v2020_v25 = vpop.eup %2019 }
 0x829   :  { %v1547_v27 = vmul.f32 %v2020_v25, %v2759_v33 }
 0x82a   :  { %v2022_v42 = vpop.eup %2021 }
 0x82b   :  { %v1549_v19 = vadd.f32 %v1548_v24, %v1547_v27 }
 0x82d   :  { %2023 = vtanh.f32 %v1549_v19 }
 0x83a   :  { %v2024_v43 = vpop.eup %2023 }
 0x83b   :  { %v1551_v44 = vmul.f32 %v2024_v43, %v2022_v42 }
 0x83d   :  { %1805 = vmatmul.mubr.f32.vlgmr.msra.gmra.mxu0 %v1551_v44 }
 0x8fd   :  { %v1641_v29 = vpop.f32.mrf.mxu0 }
 0x8fe   :  { %v1642_v47 = vadd.f32 %v1754_v45, %v1641_v29 }
 0x8ff   :  { %v1806_v30 = vpop.f32.mrf.mxu0 }
 0x900   :  { %1645 = vst [vmem:[#allocation11] sm:$0xff] %v1642_v47 }
 0x901   :  { %2148 = shalt.err (!%p2145_p10)
}
 0x902   :  { %1655 = dma.vmem_to_hbm [thread:$0]  %s1653_s23, 128, %s2779_s6, [#allocation5]  }
 0x903   :  { %2163 = dma.done.wait [#allocation5], 128  }
 0x904   :  { %2164 = vsyncadd [#allocation5], 4294967168 }
 0x905   :  { %1659 = vsyncpa [#allocation4], 1 }
 0x906   :  { %1660 = vsyncpa [#allocation7], 1 }
 0x907   :  { %1661 = vsyncpa [#allocation10], 1 }
 0x908   :  { %1662 = vsyncpa [#allocation5], 1 }

</bundles_post_ra>
